<compile_context>
chip_gen: v7x
topology: tpu7x:2x2x1
jax: 0.10.0
libtpu: 0.0.40
codegen_flags: <defaults>
</compile_context>

<pallas_src>
import functools

import jax
import jax.numpy as jnp
from jax.experimental import pallas as pl
from jax.experimental.pallas import tpu as pltpu

EPS = 1e-5  # torch.nn.LayerNorm default eps


# ----------------------------- kernel -------------------------------------- #

def _layer_norm(x, w, b):
    mean = jnp.mean(x, axis=-1, keepdims=True)
    var = jnp.mean(jnp.square(x - mean), axis=-1, keepdims=True)
    return (x - mean) * jax.lax.rsqrt(var + EPS) * w + b


def fused_encoder_kernel(B, T, H,
                         x_ref, enc_ln_ref, wqkv_ref, bqkv_ref, wo_ref,
                         wf1_ref, bf1_ref, wf2_ref, vec_ref,
                         o_ref, attn_scratch):
    BT, C = x_ref.shape
    L = wqkv_ref.shape[0]
    D = C // H

    x = x_ref[...]                                        # (BT, C) f32

    # encoder-level LayerNorm (layer_norm_first=False -> applied before stack)
    x = _layer_norm(x, enc_ln_ref[0:1, :], enc_ln_ref[1:2, :])

    for l in range(L):                                    # static unroll (L small)
        wqkv = wqkv_ref[l]                                # (C, 3C)  q pre-scaled
        bqkv = bqkv_ref[l]                                # (1, 3C)
        wo = wo_ref[l]                                    # (C, C)
        wf1 = wf1_ref[l]                                  # (C, F)
        bf1 = bf1_ref[l]                                  # (1, F)
        wf2 = wf2_ref[l]                                  # (F, C)
        vec = vec_ref[l]                                  # (6, C) packed vectors
        ob, ln1w, ln1b = vec[0:1, :], vec[1:2, :], vec[2:3, :]
        ln2w, ln2b, f2b = vec[3:4, :], vec[4:5, :], vec[5:6, :]

        # ---- self-attention (post-norm) ----
        residual = x
        qkv = jnp.dot(x, wqkv, preferred_element_type=jnp.float32) + bqkv
        q = qkv[:, 0 * C:1 * C].reshape(B, T, C)
        k = qkv[:, 1 * C:2 * C].reshape(B, T, C)
        v = qkv[:, 2 * C:3 * C].reshape(B, T, C)

        for h in range(H):                                # static unroll over heads
            qh = q[:, :, h * D:(h + 1) * D]               # (B, T, D)
            kh = k[:, :, h * D:(h + 1) * D]
            vh = v[:, :, h * D:(h + 1) * D]
            s = jnp.einsum("bqd,bkd->bqk", qh, kh,
                           preferred_element_type=jnp.float32)    # (B, T, T)
            s = s - jnp.max(s, axis=-1, keepdims=True)
            p = jnp.exp(s)
            denom = jnp.sum(p, axis=-1, keepdims=True)
            oh = jnp.einsum("bqk,bkd->bqd", p, vh,
                            preferred_element_type=jnp.float32)   # (B, T, D)
            oh = oh * pl.reciprocal(denom, approx=False)  # exact, keeps 1e-4 tol
            attn_scratch[:, h * D:(h + 1) * D] = oh.reshape(BT, D)

        attn = jnp.dot(attn_scratch[...], wo,
                       preferred_element_type=jnp.float32) + ob
        x = _layer_norm(residual + attn, ln1w, ln1b)

        # ---- feed-forward ----
        residual = x
        h1 = jnp.dot(x, wf1, preferred_element_type=jnp.float32) + bf1
        # TODO(synk): reference layer activation not given; using tanh-approx
        # GELU (wav2vec2-style).  Exact-erf GELU would differ slightly.
        h1 = jax.nn.gelu(h1, approximate=True)
        h2 = jnp.dot(h1, wf2, preferred_element_type=jnp.float32) + f2b
        x = _layer_norm(residual + h2, ln2w, ln2b)

    o_ref[...] = x.astype(o_ref.dtype)


# ----------------------------- wrappers ------------------------------------ #

def _full_spec(shape):
    if len(shape) == 2:
        return pl.BlockSpec(shape, lambda i: (0, 0))
    return pl.BlockSpec(shape, lambda i: (0, 0, 0))


def pack_params(params, n_heads):
    """Host-side packing: QKV fusion, layer stacking, scale folding."""
    layers = params["layers"]
    C = layers[0]["qw"].shape[0]
    D = C // n_heads
    scale = 1.0 / (D ** 0.5)

    wqkv = jnp.stack([jnp.concatenate(
        [p["qw"] * scale, p["kw"], p["vw"]], axis=1) for p in layers])
    bqkv = jnp.stack([jnp.concatenate(
        [p["qb"] * scale, p["kb"], p["vb"]], axis=1) for p in layers])
    wo = jnp.stack([p["ow"] for p in layers])
    wf1 = jnp.stack([p["f1w"] for p in layers])
    bf1 = jnp.stack([p["f1b"] for p in layers])
    wf2 = jnp.stack([p["f2w"] for p in layers])
    vec = jnp.stack([jnp.concatenate(
        [p["ob"], p["ln1w"], p["ln1b"], p["ln2w"], p["ln2b"], p["f2b"]],
        axis=0) for p in layers])                        # (L, 6, C)
    enc_ln = jnp.stack([params["enc_ln_w"], params["enc_ln_b"]])  # (2, C)
    return {"wqkv": wqkv, "bqkv": bqkv, "wo": wo, "wf1": wf1, "bf1": bf1,
            "wf2": wf2, "vec": vec, "enc_ln": enc_ln}


def transformer_encoder_forward(x, packed, n_heads):
    """Whole encoder (pre-LN + L post-norm layers) in one pallas_call."""
    B, T, C = x.shape
    BT = B * T
    args = (x.reshape(BT, C), packed["enc_ln"], packed["wqkv"], packed["bqkv"],
            packed["wo"], packed["wf1"], packed["bf1"], packed["wf2"],
            packed["vec"])
    out = pl.pallas_call(
        functools.partial(fused_encoder_kernel, B, T, n_heads),
        grid=(1,),
        out_shape=jax.ShapeDtypeStruct((BT, C), jnp.float32),
        in_specs=[_full_spec(a.shape) for a in args],
        out_specs=pl.BlockSpec((BT, C), lambda i: (0, 0)),
        scratch_shapes=[pltpu.VMEM((BT, C), jnp.float32)],
        compiler_params=pltpu.CompilerParams(dimension_semantics=("arbitrary",)),
    )(*args)
    return out.reshape(B, T, C)


# ------------------------- deterministic init ------------------------------ #

def init_params(key, n_layers, embed_dim, ffn_dim):
    # init_bert_params: Linear weights ~ N(0, 0.02), biases zero; LN is (1, 0).
    C, F = embed_dim, ffn_dim

    def normal(k, shape):
        return 0.02 * jax.random.normal(k, shape, jnp.float32)

    layers = []
    for l in range(n_layers):
        ks = jax.random.split(jax.random.fold_in(key, l), 6)
        layers.append({
            "qw": normal(ks[0], (C, C)), "qb": jnp.zeros((1, C), jnp.float32),
            "kw": normal(ks[1], (C, C)), "kb": jnp.zeros((1, C), jnp.float32),
            "vw": normal(ks[2], (C, C)), "vb": jnp.zeros((1, C), jnp.float32),
            "ow": normal(ks[3], (C, C)), "ob": jnp.zeros((1, C), jnp.float32),
            "ln1w": jnp.ones((1, C), jnp.float32),
            "ln1b": jnp.zeros((1, C), jnp.float32),
            "f1w": normal(ks[4], (C, F)), "f1b": jnp.zeros((1, F), jnp.float32),
            "f2w": normal(ks[5], (F, C)), "f2b": jnp.zeros((1, C), jnp.float32),
            "ln2w": jnp.ones((1, C), jnp.float32),
            "ln2b": jnp.zeros((1, C), jnp.float32),
        })
    return {
        "layers": layers,
        "enc_ln_w": jnp.ones((C,), jnp.float32),
        "enc_ln_b": jnp.zeros((C,), jnp.float32),
    }


# --------------------------- pure-JAX reference ----------------------------- #

def _ref_ln(y, w, b):
    m = y.mean(-1, keepdims=True)
    v = ((y - m) ** 2).mean(-1, keepdims=True)
    return (y - m) / jnp.sqrt(v + EPS) * w.reshape(-1) + b.reshape(-1)


def ref_layer(x, p, H):
    B, T, C = x.shape
    D = C // H
    scale = 1.0 / (D ** 0.5)
    res = x
    q = (x @ p["qw"] + p["qb"]) * scale
    k = x @ p["kw"] + p["kb"]
    v = x @ p["vw"] + p["vb"]
    q = q.reshape(B, T, H, D).transpose(0, 2, 1, 3)
    k = k.reshape(B, T, H, D).transpose(0, 2, 1, 3)
    v = v.reshape(B, T, H, D).transpose(0, 2, 1, 3)
    s = jnp.einsum("bhtd,bhsd->bhts", q, k)
    pm = jax.nn.softmax(s, axis=-1)
    a = jnp.einsum("bhts,bhsd->bhtd", pm, v).transpose(0, 2, 1, 3).reshape(B, T, C)
    a = a @ p["ow"] + p["ob"]
    x = _ref_ln(res + a, p["ln1w"], p["ln1b"])
    res = x
    h1 = jax.nn.gelu(x @ p["f1w"] + p["f1b"], approximate=True)
    x = _ref_ln(res + h1 @ p["f2w"] + p["f2b"], p["ln2w"], p["ln2b"])
    return x


def ref_forward(x, params, H, layer_norm_first=False):
    if not layer_norm_first:
        x = _ref_ln(x, params["enc_ln_w"], params["enc_ln_b"])
    for p in params["layers"]:
        x = ref_layer(x, p, H)
    if layer_norm_first:
        x = _ref_ln(x, params["enc_ln_w"], params["enc_ln_b"])
    return x


# --------------------------------- main ------------------------------------ #

if __name__ == "__main__":
    # args: encoder_embed_dim=32, encoder_ffn_embed_dim=64,
    #       encoder_attention_heads=4, encoder_layers=2, layer_norm_first=False,
    #       all dropouts=0 (eval), encoder_layerdrop=0.
    B, T, C, F, H, L = 2, 8, 32, 64, 4, 2
    key = jax.random.PRNGKey(0)

    params = init_params(key, L, C, F)
    packed = pack_params(params, H)
    x = jax.random.normal(jax.random.fold_in(key, 999), (B, T, C), jnp.float32)

    out = transformer_encoder_forward(x, packed, H)
    out = jax.block_until_ready(out)

    ref = ref_forward(x, params, H, layer_norm_first=False)
    assert out.shape == (B, T, C)
    assert jnp.allclose(out, ref, atol=1e-4, rtol=1e-4), (
        f"max abs err {jnp.max(jnp.abs(out - ref))}")

    print("KERNEL_OK")
</pallas_src>

<mosaic_0001>
module attributes {stable_mosaic.version = 11 : i64} {
  func.func @fused_encoder_kernel(%arg0: i32, %arg1: memref<16x32xf32, #tpu.memory_space<vmem>>, %arg2: memref<2x32xf32, #tpu.memory_space<vmem>>, %arg3: memref<2x32x96xf32, #tpu.memory_space<vmem>>, %arg4: memref<2x1x96xf32, #tpu.memory_space<vmem>>, %arg5: memref<2x32x32xf32, #tpu.memory_space<vmem>>, %arg6: memref<2x32x64xf32, #tpu.memory_space<vmem>>, %arg7: memref<2x1x64xf32, #tpu.memory_space<vmem>>, %arg8: memref<2x64x32xf32, #tpu.memory_space<vmem>>, %arg9: memref<2x6x32xf32, #tpu.memory_space<vmem>>, %arg10: memref<16x32xf32, #tpu.memory_space<vmem>>, %arg11: memref<16x32xf32, #tpu.memory_space<vmem>>) attributes {dimension_semantics = [#tpu.dimension_semantics<arbitrary>], iteration_bounds = array<i64: 1>, scalar_prefetch = 0 : i64, scratch_operands = 1 : i64, tpu.core_type = #tpu.core_type<tc>, window_params = [{pipeline_mode = #tpu.pipeline_mode<synchronous>, transform_indices = @transform_0, window_bounds = array<i64: 16, 32>}, {pipeline_mode = #tpu.pipeline_mode<synchronous>, transform_indices = @transform_1, window_bounds = array<i64: 2, 32>}, {pipeline_mode = #tpu.pipeline_mode<synchronous>, transform_indices = @transform_2, window_bounds = array<i64: 2, 32, 96>}, {pipeline_mode = #tpu.pipeline_mode<synchronous>, transform_indices = @transform_3, window_bounds = array<i64: 2, 1, 96>}, {pipeline_mode = #tpu.pipeline_mode<synchronous>, transform_indices = @transform_4, window_bounds = array<i64: 2, 32, 32>}, {pipeline_mode = #tpu.pipeline_mode<synchronous>, transform_indices = @transform_5, window_bounds = array<i64: 2, 32, 64>}, {pipeline_mode = #tpu.pipeline_mode<synchronous>, transform_indices = @transform_6, window_bounds = array<i64: 2, 1, 64>}, {pipeline_mode = #tpu.pipeline_mode<synchronous>, transform_indices = @transform_7, window_bounds = array<i64: 2, 64, 32>}, {pipeline_mode = #tpu.pipeline_mode<synchronous>, transform_indices = @transform_8, window_bounds = array<i64: 2, 6, 32>}, {pipeline_mode = #tpu.pipeline_mode<synchronous>, transform_indices = @transform_9, window_bounds = array<i64: 16, 32>}]} {
    %c0 = arith.constant 0 : index
    %c0_0 = arith.constant 0 : index
    %0 = vector.load %arg1[%c0, %c0_0] : memref<16x32xf32, #tpu.memory_space<vmem>>, vector<16x32xf32>
    %c0_1 = arith.constant 0 : index
    %c0_2 = arith.constant 0 : index
    %1 = vector.load %arg2[%c0_1, %c0_2] : memref<2x32xf32, #tpu.memory_space<vmem>>, vector<1x32xf32>
    %c1 = arith.constant 1 : index
    %c0_3 = arith.constant 0 : index
    %2 = vector.load %arg2[%c1, %c0_3] : memref<2x32xf32, #tpu.memory_space<vmem>>, vector<1x32xf32>
    %cst = arith.constant dense<0.000000e+00> : vector<16xf32>
    %3 = vector.multi_reduction <add>, %0, %cst [1] : vector<16x32xf32> to vector<16xf32>
    %4 = vector.shape_cast %3 : vector<16xf32> to vector<16x1xf32>
    %cst_4 = arith.constant 3.200000e+01 : f32
    %5 = vector.broadcast %cst_4 : f32 to vector<16x1xf32>
    %6 = arith.divf %4, %5 : vector<16x1xf32>
    %7 = vector.broadcast %6 : vector<16x1xf32> to vector<16x32xf32>
    %8 = arith.subf %0, %7 : vector<16x32xf32>
    %9 = arith.mulf %8, %8 : vector<16x32xf32>
    %cst_5 = arith.constant dense<0.000000e+00> : vector<16xf32>
    %10 = vector.multi_reduction <add>, %9, %cst_5 [1] : vector<16x32xf32> to vector<16xf32>
    %11 = vector.shape_cast %10 : vector<16xf32> to vector<16x1xf32>
    %cst_6 = arith.constant 3.200000e+01 : f32
    %12 = vector.broadcast %cst_6 : f32 to vector<16x1xf32>
    %13 = arith.divf %11, %12 : vector<16x1xf32>
    %14 = vector.broadcast %6 : vector<16x1xf32> to vector<16x32xf32>
    %15 = arith.subf %0, %14 : vector<16x32xf32>
    %cst_7 = arith.constant 9.99999974E-6 : f32
    %16 = vector.broadcast %cst_7 : f32 to vector<16x1xf32>
    %17 = arith.addf %13, %16 : vector<16x1xf32>
    %18 = math.rsqrt %17 : vector<16x1xf32>
    %19 = vector.broadcast %18 : vector<16x1xf32> to vector<16x32xf32>
    %20 = arith.mulf %15, %19 : vector<16x32xf32>
    %21 = vector.broadcast %1 : vector<1x32xf32> to vector<16x32xf32>
    %22 = arith.mulf %20, %21 : vector<16x32xf32>
    %23 = vector.broadcast %2 : vector<1x32xf32> to vector<16x32xf32>
    %24 = arith.addf %22, %23 : vector<16x32xf32>
    %c0_8 = arith.constant 0 : index
    %c0_9 = arith.constant 0 : index
    %c0_10 = arith.constant 0 : index
    %25 = vector.load %arg3[%c0_8, %c0_9, %c0_10] : memref<2x32x96xf32, #tpu.memory_space<vmem>>, vector<1x32x96xf32>
    %26 = vector.shape_cast %25 : vector<1x32x96xf32> to vector<32x96xf32>
    %c0_11 = arith.constant 0 : index
    %c0_12 = arith.constant 0 : index
    %c0_13 = arith.constant 0 : index
    %27 = vector.load %arg4[%c0_11, %c0_12, %c0_13] : memref<2x1x96xf32, #tpu.memory_space<vmem>>, vector<1x1x96xf32>
    %28 = vector.shape_cast %27 : vector<1x1x96xf32> to vector<1x96xf32>
    %c0_14 = arith.constant 0 : index
    %c0_15 = arith.constant 0 : index
    %c0_16 = arith.constant 0 : index
    %29 = vector.load %arg5[%c0_14, %c0_15, %c0_16] : memref<2x32x32xf32, #tpu.memory_space<vmem>>, vector<1x32x32xf32>
    %30 = vector.shape_cast %29 : vector<1x32x32xf32> to vector<32x32xf32>
    %c0_17 = arith.constant 0 : index
    %c0_18 = arith.constant 0 : index
    %c0_19 = arith.constant 0 : index
    %31 = vector.load %arg6[%c0_17, %c0_18, %c0_19] : memref<2x32x64xf32, #tpu.memory_space<vmem>>, vector<1x32x64xf32>
    %32 = vector.shape_cast %31 : vector<1x32x64xf32> to vector<32x64xf32>
    %c0_20 = arith.constant 0 : index
    %c0_21 = arith.constant 0 : index
    %c0_22 = arith.constant 0 : index
    %33 = vector.load %arg7[%c0_20, %c0_21, %c0_22] : memref<2x1x64xf32, #tpu.memory_space<vmem>>, vector<1x1x64xf32>
    %34 = vector.shape_cast %33 : vector<1x1x64xf32> to vector<1x64xf32>
    %c0_23 = arith.constant 0 : index
    %c0_24 = arith.constant 0 : index
    %c0_25 = arith.constant 0 : index
    %35 = vector.load %arg8[%c0_23, %c0_24, %c0_25] : memref<2x64x32xf32, #tpu.memory_space<vmem>>, vector<1x64x32xf32>
    %36 = vector.shape_cast %35 : vector<1x64x32xf32> to vector<64x32xf32>
    %c0_26 = arith.constant 0 : index
    %c0_27 = arith.constant 0 : index
    %c0_28 = arith.constant 0 : index
    %37 = vector.load %arg9[%c0_26, %c0_27, %c0_28] : memref<2x6x32xf32, #tpu.memory_space<vmem>>, vector<1x6x32xf32>
    %38 = vector.shape_cast %37 : vector<1x6x32xf32> to vector<6x32xf32>
    %39 = vector.extract_strided_slice %38 {offsets = [0, 0], sizes = [1, 32], strides = [1, 1]} : vector<6x32xf32> to vector<1x32xf32>
    %40 = vector.extract_strided_slice %38 {offsets = [1, 0], sizes = [1, 32], strides = [1, 1]} : vector<6x32xf32> to vector<1x32xf32>
    %41 = vector.extract_strided_slice %38 {offsets = [2, 0], sizes = [1, 32], strides = [1, 1]} : vector<6x32xf32> to vector<1x32xf32>
    %42 = vector.extract_strided_slice %38 {offsets = [3, 0], sizes = [1, 32], strides = [1, 1]} : vector<6x32xf32> to vector<1x32xf32>
    %43 = vector.extract_strided_slice %38 {offsets = [4, 0], sizes = [1, 32], strides = [1, 1]} : vector<6x32xf32> to vector<1x32xf32>
    %44 = vector.extract_strided_slice %38 {offsets = [5, 0], sizes = [1, 32], strides = [1, 1]} : vector<6x32xf32> to vector<1x32xf32>
    %cst_29 = arith.constant dense<0.000000e+00> : vector<16x96xf32>
    %45 = tpu.matmul %24, %26, %cst_29 {dimension_numbers = #tpu.dot_dimension_numbers<[1], [0], [0], [1], [0, 0, 1, 1], [], []>} : vector<16x32xf32>, vector<32x96xf32>, vector<16x96xf32> -> vector<16x96xf32>
    %46 = vector.broadcast %28 : vector<1x96xf32> to vector<16x96xf32>
    %47 = arith.addf %45, %46 : vector<16x96xf32>
    %48 = vector.extract_strided_slice %47 {offsets = [0, 0], sizes = [16, 32], strides = [1, 1]} : vector<16x96xf32> to vector<16x32xf32>
    %49 = vector.shape_cast %48 : vector<16x32xf32> to vector<2x8x32xf32>
    %50 = vector.extract_strided_slice %47 {offsets = [0, 32], sizes = [16, 32], strides = [1, 1]} : vector<16x96xf32> to vector<16x32xf32>
    %51 = vector.shape_cast %50 : vector<16x32xf32> to vector<2x8x32xf32>
    %52 = vector.extract_strided_slice %47 {offsets = [0, 64], sizes = [16, 32], strides = [1, 1]} : vector<16x96xf32> to vector<16x32xf32>
    %53 = vector.shape_cast %52 : vector<16x32xf32> to vector<2x8x32xf32>
    %54 = vector.extract_strided_slice %49 {offsets = [0, 0, 0], sizes = [2, 8, 8], strides = [1, 1, 1]} : vector<2x8x32xf32> to vector<2x8x8xf32>
    %55 = vector.extract_strided_slice %51 {offsets = [0, 0, 0], sizes = [2, 8, 8], strides = [1, 1, 1]} : vector<2x8x32xf32> to vector<2x8x8xf32>
    %56 = vector.extract_strided_slice %53 {offsets = [0, 0, 0], sizes = [2, 8, 8], strides = [1, 1, 1]} : vector<2x8x32xf32> to vector<2x8x8xf32>
    "tpu.trace_start"() <{level = 10 : i32, message = "bqd,bkd->bqk"}> : () -> ()
    %cst_30 = arith.constant dense<0.000000e+00> : vector<2x8x8xf32>
    %57 = tpu.matmul %54, %55, %cst_30 {dimension_numbers = #tpu.dot_dimension_numbers<[2], [2], [1], [1], [0, 0, 0, 1, 1, 1], [0], [0]>} : vector<2x8x8xf32>, vector<2x8x8xf32>, vector<2x8x8xf32> -> vector<2x8x8xf32>
    "tpu.trace_stop"() : () -> ()
    %cst_31 = arith.constant dense<0xFF800000> : vector<2x8xf32>
    %58 = vector.multi_reduction <maximumf>, %57, %cst_31 [2] : vector<2x8x8xf32> to vector<2x8xf32>
    %59 = vector.shape_cast %58 : vector<2x8xf32> to vector<2x8x1xf32>
    %60 = vector.broadcast %59 : vector<2x8x1xf32> to vector<2x8x8xf32>
    %61 = arith.subf %57, %60 : vector<2x8x8xf32>
    %62 = math.exp %61 : vector<2x8x8xf32>
    %cst_32 = arith.constant dense<0.000000e+00> : vector<2x8xf32>
    %63 = vector.multi_reduction <add>, %62, %cst_32 [2] : vector<2x8x8xf32> to vector<2x8xf32>
    %64 = vector.shape_cast %63 : vector<2x8xf32> to vector<2x8x1xf32>
    "tpu.trace_start"() <{level = 10 : i32, message = "bqk,bkd->bqd"}> : () -> ()
    %cst_33 = arith.constant dense<0.000000e+00> : vector<2x8x8xf32>
    %65 = tpu.matmul %62, %56, %cst_33 {dimension_numbers = #tpu.dot_dimension_numbers<[2], [1], [1], [2], [0, 0, 0, 1, 1, 2], [0], [0]>} : vector<2x8x8xf32>, vector<2x8x8xf32>, vector<2x8x8xf32> -> vector<2x8x8xf32>
    "tpu.trace_stop"() : () -> ()
    %66 = tpu.reciprocal %64 : vector<2x8x1xf32> -> vector<2x8x1xf32>
    %67 = vector.broadcast %66 : vector<2x8x1xf32> to vector<2x8x8xf32>
    %68 = arith.mulf %65, %67 : vector<2x8x8xf32>
    %69 = vector.shape_cast %68 : vector<2x8x8xf32> to vector<16x8xf32>
    %c0_34 = arith.constant 0 : index
    %c0_35 = arith.constant 0 : index
    %70 = vector.load %arg11[%c0_34, %c0_35] : memref<16x32xf32, #tpu.memory_space<vmem>>, vector<16x8xf32>
    tpu.vector_store %arg11[%c0_34, %c0_35], %69 {strides = array<i32>} : memref<16x32xf32, #tpu.memory_space<vmem>>, vector<16x8xf32>,
    %71 = vector.extract_strided_slice %49 {offsets = [0, 0, 8], sizes = [2, 8, 8], strides = [1, 1, 1]} : vector<2x8x32xf32> to vector<2x8x8xf32>
    %72 = vector.extract_strided_slice %51 {offsets = [0, 0, 8], sizes = [2, 8, 8], strides = [1, 1, 1]} : vector<2x8x32xf32> to vector<2x8x8xf32>
    %73 = vector.extract_strided_slice %53 {offsets = [0, 0, 8], sizes = [2, 8, 8], strides = [1, 1, 1]} : vector<2x8x32xf32> to vector<2x8x8xf32>
    "tpu.trace_start"() <{level = 10 : i32, message = "bqd,bkd->bqk"}> : () -> ()
    %cst_36 = arith.constant dense<0.000000e+00> : vector<2x8x8xf32>
    %74 = tpu.matmul %71, %72, %cst_36 {dimension_numbers = #tpu.dot_dimension_numbers<[2], [2], [1], [1], [0, 0, 0, 1, 1, 1], [0], [0]>} : vector<2x8x8xf32>, vector<2x8x8xf32>, vector<2x8x8xf32> -> vector<2x8x8xf32>
    "tpu.trace_stop"() : () -> ()
    %cst_37 = arith.constant dense<0xFF800000> : vector<2x8xf32>
    %75 = vector.multi_reduction <maximumf>, %74, %cst_37 [2] : vector<2x8x8xf32> to vector<2x8xf32>
    %76 = vector.shape_cast %75 : vector<2x8xf32> to vector<2x8x1xf32>
    %77 = vector.broadcast %76 : vector<2x8x1xf32> to vector<2x8x8xf32>
    %78 = arith.subf %74, %77 : vector<2x8x8xf32>
    %79 = math.exp %78 : vector<2x8x8xf32>
    %cst_38 = arith.constant dense<0.000000e+00> : vector<2x8xf32>
    %80 = vector.multi_reduction <add>, %79, %cst_38 [2] : vector<2x8x8xf32> to vector<2x8xf32>
    %81 = vector.shape_cast %80 : vector<2x8xf32> to vector<2x8x1xf32>
    "tpu.trace_start"() <{level = 10 : i32, message = "bqk,bkd->bqd"}> : () -> ()
    %cst_39 = arith.constant dense<0.000000e+00> : vector<2x8x8xf32>
    %82 = tpu.matmul %79, %73, %cst_39 {dimension_numbers = #tpu.dot_dimension_numbers<[2], [1], [1], [2], [0, 0, 0, 1, 1, 2], [0], [0]>} : vector<2x8x8xf32>, vector<2x8x8xf32>, vector<2x8x8xf32> -> vector<2x8x8xf32>
    "tpu.trace_stop"() : () -> ()
    %83 = tpu.reciprocal %81 : vector<2x8x1xf32> -> vector<2x8x1xf32>
    %84 = vector.broadcast %83 : vector<2x8x1xf32> to vector<2x8x8xf32>
    %85 = arith.mulf %82, %84 : vector<2x8x8xf32>
    %86 = vector.shape_cast %85 : vector<2x8x8xf32> to vector<16x8xf32>
    %c0_40 = arith.constant 0 : index
    %c8 = arith.constant 8 : index
    %87 = vector.load %arg11[%c0_40, %c8] : memref<16x32xf32, #tpu.memory_space<vmem>>, vector<16x8xf32>
    tpu.vector_store %arg11[%c0_40, %c8], %86 {strides = array<i32>} : memref<16x32xf32, #tpu.memory_space<vmem>>, vector<16x8xf32>,
    %88 = vector.extract_strided_slice %49 {offsets = [0, 0, 16], sizes = [2, 8, 8], strides = [1, 1, 1]} : vector<2x8x32xf32> to vector<2x8x8xf32>
    %89 = vector.extract_strided_slice %51 {offsets = [0, 0, 16], sizes = [2, 8, 8], strides = [1, 1, 1]} : vector<2x8x32xf32> to vector<2x8x8xf32>
    %90 = vector.extract_strided_slice %53 {offsets = [0, 0, 16], sizes = [2, 8, 8], strides = [1, 1, 1]} : vector<2x8x32xf32> to vector<2x8x8xf32>
    "tpu.trace_start"() <{level = 10 : i32, message = "bqd,bkd->bqk"}> : () -> ()
    %cst_41 = arith.constant dense<0.000000e+00> : vector<2x8x8xf32>
    %91 = tpu.matmul %88, %89, %cst_41 {dimension_numbers = #tpu.dot_dimension_numbers<[2], [2], [1], [1], [0, 0, 0, 1, 1, 1], [0], [0]>} : vector<2x8x8xf32>, vector<2x8x8xf32>, vector<2x8x8xf32> -> vector<2x8x8xf32>
    "tpu.trace_stop"() : () -> ()
    %cst_42 = arith.constant dense<0xFF800000> : vector<2x8xf32>
    %92 = vector.multi_reduction <maximumf>, %91, %cst_42 [2] : vector<2x8x8xf32> to vector<2x8xf32>
    %93 = vector.shape_cast %92 : vector<2x8xf32> to vector<2x8x1xf32>
    %94 = vector.broadcast %93 : vector<2x8x1xf32> to vector<2x8x8xf32>
    %95 = arith.subf %91, %94 : vector<2x8x8xf32>
    %96 = math.exp %95 : vector<2x8x8xf32>
    %cst_43 = arith.constant dense<0.000000e+00> : vector<2x8xf32>
    %97 = vector.multi_reduction <add>, %96, %cst_43 [2] : vector<2x8x8xf32> to vector<2x8xf32>
    %98 = vector.shape_cast %97 : vector<2x8xf32> to vector<2x8x1xf32>
    "tpu.trace_start"() <{level = 10 : i32, message = "bqk,bkd->bqd"}> : () -> ()
    %cst_44 = arith.constant dense<0.000000e+00> : vector<2x8x8xf32>
    %99 = tpu.matmul %96, %90, %cst_44 {dimension_numbers = #tpu.dot_dimension_numbers<[2], [1], [1], [2], [0, 0, 0, 1, 1, 2], [0], [0]>} : vector<2x8x8xf32>, vector<2x8x8xf32>, vector<2x8x8xf32> -> vector<2x8x8xf32>
    "tpu.trace_stop"() : () -> ()
    %100 = tpu.reciprocal %98 : vector<2x8x1xf32> -> vector<2x8x1xf32>
    %101 = vector.broadcast %100 : vector<2x8x1xf32> to vector<2x8x8xf32>
    %102 = arith.mulf %99, %101 : vector<2x8x8xf32>
    %103 = vector.shape_cast %102 : vector<2x8x8xf32> to vector<16x8xf32>
    %c0_45 = arith.constant 0 : index
    %c16 = arith.constant 16 : index
    %104 = vector.load %arg11[%c0_45, %c16] : memref<16x32xf32, #tpu.memory_space<vmem>>, vector<16x8xf32>
    tpu.vector_store %arg11[%c0_45, %c16], %103 {strides = array<i32>} : memref<16x32xf32, #tpu.memory_space<vmem>>, vector<16x8xf32>,
    %105 = vector.extract_strided_slice %49 {offsets = [0, 0, 24], sizes = [2, 8, 8], strides = [1, 1, 1]} : vector<2x8x32xf32> to vector<2x8x8xf32>
    %106 = vector.extract_strided_slice %51 {offsets = [0, 0, 24], sizes = [2, 8, 8], strides = [1, 1, 1]} : vector<2x8x32xf32> to vector<2x8x8xf32>
    %107 = vector.extract_strided_slice %53 {offsets = [0, 0, 24], sizes = [2, 8, 8], strides = [1, 1, 1]} : vector<2x8x32xf32> to vector<2x8x8xf32>
    "tpu.trace_start"() <{level = 10 : i32, message = "bqd,bkd->bqk"}> : () -> ()
    %cst_46 = arith.constant dense<0.000000e+00> : vector<2x8x8xf32>
    %108 = tpu.matmul %105, %106, %cst_46 {dimension_numbers = #tpu.dot_dimension_numbers<[2], [2], [1], [1], [0, 0, 0, 1, 1, 1], [0], [0]>} : vector<2x8x8xf32>, vector<2x8x8xf32>, vector<2x8x8xf32> -> vector<2x8x8xf32>
    "tpu.trace_stop"() : () -> ()
    %cst_47 = arith.constant dense<0xFF800000> : vector<2x8xf32>
    %109 = vector.multi_reduction <maximumf>, %108, %cst_47 [2] : vector<2x8x8xf32> to vector<2x8xf32>
    %110 = vector.shape_cast %109 : vector<2x8xf32> to vector<2x8x1xf32>
    %111 = vector.broadcast %110 : vector<2x8x1xf32> to vector<2x8x8xf32>
    %112 = arith.subf %108, %111 : vector<2x8x8xf32>
    %113 = math.exp %112 : vector<2x8x8xf32>
    %cst_48 = arith.constant dense<0.000000e+00> : vector<2x8xf32>
    %114 = vector.multi_reduction <add>, %113, %cst_48 [2] : vector<2x8x8xf32> to vector<2x8xf32>
    %115 = vector.shape_cast %114 : vector<2x8xf32> to vector<2x8x1xf32>
    "tpu.trace_start"() <{level = 10 : i32, message = "bqk,bkd->bqd"}> : () -> ()
    %cst_49 = arith.constant dense<0.000000e+00> : vector<2x8x8xf32>
    %116 = tpu.matmul %113, %107, %cst_49 {dimension_numbers = #tpu.dot_dimension_numbers<[2], [1], [1], [2], [0, 0, 0, 1, 1, 2], [0], [0]>} : vector<2x8x8xf32>, vector<2x8x8xf32>, vector<2x8x8xf32> -> vector<2x8x8xf32>
    "tpu.trace_stop"() : () -> ()
    %117 = tpu.reciprocal %115 : vector<2x8x1xf32> -> vector<2x8x1xf32>
    %118 = vector.broadcast %117 : vector<2x8x1xf32> to vector<2x8x8xf32>
    %119 = arith.mulf %116, %118 : vector<2x8x8xf32>
    %120 = vector.shape_cast %119 : vector<2x8x8xf32> to vector<16x8xf32>
    %c0_50 = arith.constant 0 : index
    %c24 = arith.constant 24 : index
    %121 = vector.load %arg11[%c0_50, %c24] : memref<16x32xf32, #tpu.memory_space<vmem>>, vector<16x8xf32>
    tpu.vector_store %arg11[%c0_50, %c24], %120 {strides = array<i32>} : memref<16x32xf32, #tpu.memory_space<vmem>>, vector<16x8xf32>,
    %c0_51 = arith.constant 0 : index
    %c0_52 = arith.constant 0 : index
    %122 = vector.load %arg11[%c0_51, %c0_52] : memref<16x32xf32, #tpu.memory_space<vmem>>, vector<16x32xf32>
    %cst_53 = arith.constant dense<0.000000e+00> : vector<16x32xf32>
    %123 = tpu.matmul %122, %30, %cst_53 {dimension_numbers = #tpu.dot_dimension_numbers<[1], [0], [0], [1], [0, 0, 1, 1], [], []>} : vector<16x32xf32>, vector<32x32xf32>, vector<16x32xf32> -> vector<16x32xf32>
    %124 = vector.broadcast %39 : vector<1x32xf32> to vector<16x32xf32>
    %125 = arith.addf %123, %124 : vector<16x32xf32>
    %126 = arith.addf %24, %125 : vector<16x32xf32>
    %cst_54 = arith.constant dense<0.000000e+00> : vector<16xf32>
    %127 = vector.multi_reduction <add>, %126, %cst_54 [1] : vector<16x32xf32> to vector<16xf32>
    %128 = vector.shape_cast %127 : vector<16xf32> to vector<16x1xf32>
    %cst_55 = arith.constant 3.200000e+01 : f32
    %129 = vector.broadcast %cst_55 : f32 to vector<16x1xf32>
    %130 = arith.divf %128, %129 : vector<16x1xf32>
    %131 = vector.broadcast %130 : vector<16x1xf32> to vector<16x32xf32>
    %132 = arith.subf %126, %131 : vector<16x32xf32>
    %133 = arith.mulf %132, %132 : vector<16x32xf32>
    %cst_56 = arith.constant dense<0.000000e+00> : vector<16xf32>
    %134 = vector.multi_reduction <add>, %133, %cst_56 [1] : vector<16x32xf32> to vector<16xf32>
    %135 = vector.shape_cast %134 : vector<16xf32> to vector<16x1xf32>
    %cst_57 = arith.constant 3.200000e+01 : f32
    %136 = vector.broadcast %cst_57 : f32 to vector<16x1xf32>
    %137 = arith.divf %135, %136 : vector<16x1xf32>
    %138 = vector.broadcast %130 : vector<16x1xf32> to vector<16x32xf32>
    %139 = arith.subf %126, %138 : vector<16x32xf32>
    %cst_58 = arith.constant 9.99999974E-6 : f32
    %140 = vector.broadcast %cst_58 : f32 to vector<16x1xf32>
    %141 = arith.addf %137, %140 : vector<16x1xf32>
    %142 = math.rsqrt %141 : vector<16x1xf32>
    %143 = vector.broadcast %142 : vector<16x1xf32> to vector<16x32xf32>
    %144 = arith.mulf %139, %143 : vector<16x32xf32>
    %145 = vector.broadcast %40 : vector<1x32xf32> to vector<16x32xf32>
    %146 = arith.mulf %144, %145 : vector<16x32xf32>
    %147 = vector.broadcast %41 : vector<1x32xf32> to vector<16x32xf32>
    %148 = arith.addf %146, %147 : vector<16x32xf32>
    %cst_59 = arith.constant dense<0.000000e+00> : vector<16x64xf32>
    %149 = tpu.matmul %148, %32, %cst_59 {dimension_numbers = #tpu.dot_dimension_numbers<[1], [0], [0], [1], [0, 0, 1, 1], [], []>} : vector<16x32xf32>, vector<32x64xf32>, vector<16x64xf32> -> vector<16x64xf32>
    %150 = vector.broadcast %34 : vector<1x64xf32> to vector<16x64xf32>
    %151 = arith.addf %149, %150 : vector<16x64xf32>
    %152 = arith.mulf %151, %151 : vector<16x64xf32>
    %153 = arith.mulf %151, %152 : vector<16x64xf32>
    %cst_60 = arith.constant 4.471500e-02 : f32
    %154 = vector.broadcast %cst_60 : f32 to vector<16x64xf32>
    %155 = arith.mulf %154, %153 : vector<16x64xf32>
    %156 = arith.addf %151, %155 : vector<16x64xf32>
    %cst_61 = arith.constant 0.797884583 : f32
    %157 = vector.broadcast %cst_61 : f32 to vector<16x64xf32>
    %158 = arith.mulf %157, %156 : vector<16x64xf32>
    %159 = math.tanh %158 : vector<16x64xf32>
    %cst_62 = arith.constant 1.000000e+00 : f32
    %160 = vector.broadcast %cst_62 : f32 to vector<16x64xf32>
    %161 = arith.addf %160, %159 : vector<16x64xf32>
    %cst_63 = arith.constant 5.000000e-01 : f32
    %162 = vector.broadcast %cst_63 : f32 to vector<16x64xf32>
    %163 = arith.mulf %162, %161 : vector<16x64xf32>
    %164 = arith.mulf %151, %163 : vector<16x64xf32>
    %cst_64 = arith.constant dense<0.000000e+00> : vector<16x32xf32>
    %165 = tpu.matmul %164, %36, %cst_64 {dimension_numbers = #tpu.dot_dimension_numbers<[1], [0], [0], [1], [0, 0, 1, 1], [], []>} : vector<16x64xf32>, vector<64x32xf32>, vector<16x32xf32> -> vector<16x32xf32>
    %166 = vector.broadcast %44 : vector<1x32xf32> to vector<16x32xf32>
    %167 = arith.addf %165, %166 : vector<16x32xf32>
    %168 = arith.addf %148, %167 : vector<16x32xf32>
    %cst_65 = arith.constant dense<0.000000e+00> : vector<16xf32>
    %169 = vector.multi_reduction <add>, %168, %cst_65 [1] : vector<16x32xf32> to vector<16xf32>
    %170 = vector.shape_cast %169 : vector<16xf32> to vector<16x1xf32>
    %cst_66 = arith.constant 3.200000e+01 : f32
    %171 = vector.broadcast %cst_66 : f32 to vector<16x1xf32>
    %172 = arith.divf %170, %171 : vector<16x1xf32>
    %173 = vector.broadcast %172 : vector<16x1xf32> to vector<16x32xf32>
    %174 = arith.subf %168, %173 : vector<16x32xf32>
    %175 = arith.mulf %174, %174 : vector<16x32xf32>
    %cst_67 = arith.constant dense<0.000000e+00> : vector<16xf32>
    %176 = vector.multi_reduction <add>, %175, %cst_67 [1] : vector<16x32xf32> to vector<16xf32>
    %177 = vector.shape_cast %176 : vector<16xf32> to vector<16x1xf32>
    %cst_68 = arith.constant 3.200000e+01 : f32
    %178 = vector.broadcast %cst_68 : f32 to vector<16x1xf32>
    %179 = arith.divf %177, %178 : vector<16x1xf32>
    %180 = vector.broadcast %172 : vector<16x1xf32> to vector<16x32xf32>
    %181 = arith.subf %168, %180 : vector<16x32xf32>
    %cst_69 = arith.constant 9.99999974E-6 : f32
    %182 = vector.broadcast %cst_69 : f32 to vector<16x1xf32>
    %183 = arith.addf %179, %182 : vector<16x1xf32>
    %184 = math.rsqrt %183 : vector<16x1xf32>
    %185 = vector.broadcast %184 : vector<16x1xf32> to vector<16x32xf32>
    %186 = arith.mulf %181, %185 : vector<16x32xf32>
    %187 = vector.broadcast %42 : vector<1x32xf32> to vector<16x32xf32>
    %188 = arith.mulf %186, %187 : vector<16x32xf32>
    %189 = vector.broadcast %43 : vector<1x32xf32> to vector<16x32xf32>
    %190 = arith.addf %188, %189 : vector<16x32xf32>
    %c1_70 = arith.constant 1 : index
    %c0_71 = arith.constant 0 : index
    %c0_72 = arith.constant 0 : index
    %191 = vector.load %arg3[%c1_70, %c0_71, %c0_72] : memref<2x32x96xf32, #tpu.memory_space<vmem>>, vector<1x32x96xf32>
    %192 = vector.shape_cast %191 : vector<1x32x96xf32> to vector<32x96xf32>
    %c1_73 = arith.constant 1 : index
    %c0_74 = arith.constant 0 : index
    %c0_75 = arith.constant 0 : index
    %193 = vector.load %arg4[%c1_73, %c0_74, %c0_75] : memref<2x1x96xf32, #tpu.memory_space<vmem>>, vector<1x1x96xf32>
    %194 = vector.shape_cast %193 : vector<1x1x96xf32> to vector<1x96xf32>
    %c1_76 = arith.constant 1 : index
    %c0_77 = arith.constant 0 : index
    %c0_78 = arith.constant 0 : index
    %195 = vector.load %arg5[%c1_76, %c0_77, %c0_78] : memref<2x32x32xf32, #tpu.memory_space<vmem>>, vector<1x32x32xf32>
    %196 = vector.shape_cast %195 : vector<1x32x32xf32> to vector<32x32xf32>
    %c1_79 = arith.constant 1 : index
    %c0_80 = arith.constant 0 : index
    %c0_81 = arith.constant 0 : index
    %197 = vector.load %arg6[%c1_79, %c0_80, %c0_81] : memref<2x32x64xf32, #tpu.memory_space<vmem>>, vector<1x32x64xf32>
    %198 = vector.shape_cast %197 : vector<1x32x64xf32> to vector<32x64xf32>
    %c1_82 = arith.constant 1 : index
    %c0_83 = arith.constant 0 : index
    %c0_84 = arith.constant 0 : index
    %199 = vector.load %arg7[%c1_82, %c0_83, %c0_84] : memref<2x1x64xf32, #tpu.memory_space<vmem>>, vector<1x1x64xf32>
    %200 = vector.shape_cast %199 : vector<1x1x64xf32> to vector<1x64xf32>
    %c1_85 = arith.constant 1 : index
    %c0_86 = arith.constant 0 : index
    %c0_87 = arith.constant 0 : index
    %201 = vector.load %arg8[%c1_85, %c0_86, %c0_87] : memref<2x64x32xf32, #tpu.memory_space<vmem>>, vector<1x64x32xf32>
    %202 = vector.shape_cast %201 : vector<1x64x32xf32> to vector<64x32xf32>
    %c1_88 = arith.constant 1 : index
    %c0_89 = arith.constant 0 : index
    %c0_90 = arith.constant 0 : index
    %203 = vector.load %arg9[%c1_88, %c0_89, %c0_90] : memref<2x6x32xf32, #tpu.memory_space<vmem>>, vector<1x6x32xf32>
    %204 = vector.shape_cast %203 : vector<1x6x32xf32> to vector<6x32xf32>
    %205 = vector.extract_strided_slice %204 {offsets = [0, 0], sizes = [1, 32], strides = [1, 1]} : vector<6x32xf32> to vector<1x32xf32>
    %206 = vector.extract_strided_slice %204 {offsets = [1, 0], sizes = [1, 32], strides = [1, 1]} : vector<6x32xf32> to vector<1x32xf32>
    %207 = vector.extract_strided_slice %204 {offsets = [2, 0], sizes = [1, 32], strides = [1, 1]} : vector<6x32xf32> to vector<1x32xf32>
    %208 = vector.extract_strided_slice %204 {offsets = [3, 0], sizes = [1, 32], strides = [1, 1]} : vector<6x32xf32> to vector<1x32xf32>
    %209 = vector.extract_strided_slice %204 {offsets = [4, 0], sizes = [1, 32], strides = [1, 1]} : vector<6x32xf32> to vector<1x32xf32>
    %210 = vector.extract_strided_slice %204 {offsets = [5, 0], sizes = [1, 32], strides = [1, 1]} : vector<6x32xf32> to vector<1x32xf32>
    %cst_91 = arith.constant dense<0.000000e+00> : vector<16x96xf32>
    %211 = tpu.matmul %190, %192, %cst_91 {dimension_numbers = #tpu.dot_dimension_numbers<[1], [0], [0], [1], [0, 0, 1, 1], [], []>} : vector<16x32xf32>, vector<32x96xf32>, vector<16x96xf32> -> vector<16x96xf32>
    %212 = vector.broadcast %194 : vector<1x96xf32> to vector<16x96xf32>
    %213 = arith.addf %211, %212 : vector<16x96xf32>
    %214 = vector.extract_strided_slice %213 {offsets = [0, 0], sizes = [16, 32], strides = [1, 1]} : vector<16x96xf32> to vector<16x32xf32>
    %215 = vector.shape_cast %214 : vector<16x32xf32> to vector<2x8x32xf32>
    %216 = vector.extract_strided_slice %213 {offsets = [0, 32], sizes = [16, 32], strides = [1, 1]} : vector<16x96xf32> to vector<16x32xf32>
    %217 = vector.shape_cast %216 : vector<16x32xf32> to vector<2x8x32xf32>
    %218 = vector.extract_strided_slice %213 {offsets = [0, 64], sizes = [16, 32], strides = [1, 1]} : vector<16x96xf32> to vector<16x32xf32>
    %219 = vector.shape_cast %218 : vector<16x32xf32> to vector<2x8x32xf32>
    %220 = vector.extract_strided_slice %215 {offsets = [0, 0, 0], sizes = [2, 8, 8], strides = [1, 1, 1]} : vector<2x8x32xf32> to vector<2x8x8xf32>
    %221 = vector.extract_strided_slice %217 {offsets = [0, 0, 0], sizes = [2, 8, 8], strides = [1, 1, 1]} : vector<2x8x32xf32> to vector<2x8x8xf32>
    %222 = vector.extract_strided_slice %219 {offsets = [0, 0, 0], sizes = [2, 8, 8], strides = [1, 1, 1]} : vector<2x8x32xf32> to vector<2x8x8xf32>
    "tpu.trace_start"() <{level = 10 : i32, message = "bqd,bkd->bqk"}> : () -> ()
    %cst_92 = arith.constant dense<0.000000e+00> : vector<2x8x8xf32>
    %223 = tpu.matmul %220, %221, %cst_92 {dimension_numbers = #tpu.dot_dimension_numbers<[2], [2], [1], [1], [0, 0, 0, 1, 1, 1], [0], [0]>} : vector<2x8x8xf32>, vector<2x8x8xf32>, vector<2x8x8xf32> -> vector<2x8x8xf32>
    "tpu.trace_stop"() : () -> ()
    %cst_93 = arith.constant dense<0xFF800000> : vector<2x8xf32>
    %224 = vector.multi_reduction <maximumf>, %223, %cst_93 [2] : vector<2x8x8xf32> to vector<2x8xf32>
    %225 = vector.shape_cast %224 : vector<2x8xf32> to vector<2x8x1xf32>
    %226 = vector.broadcast %225 : vector<2x8x1xf32> to vector<2x8x8xf32>
    %227 = arith.subf %223, %226 : vector<2x8x8xf32>
    %228 = math.exp %227 : vector<2x8x8xf32>
    %cst_94 = arith.constant dense<0.000000e+00> : vector<2x8xf32>
    %229 = vector.multi_reduction <add>, %228, %cst_94 [2] : vector<2x8x8xf32> to vector<2x8xf32>
    %230 = vector.shape_cast %229 : vector<2x8xf32> to vector<2x8x1xf32>
    "tpu.trace_start"() <{level = 10 : i32, message = "bqk,bkd->bqd"}> : () -> ()
    %cst_95 = arith.constant dense<0.000000e+00> : vector<2x8x8xf32>
    %231 = tpu.matmul %228, %222, %cst_95 {dimension_numbers = #tpu.dot_dimension_numbers<[2], [1], [1], [2], [0, 0, 0, 1, 1, 2], [0], [0]>} : vector<2x8x8xf32>, vector<2x8x8xf32>, vector<2x8x8xf32> -> vector<2x8x8xf32>
    "tpu.trace_stop"() : () -> ()
    %232 = tpu.reciprocal %230 : vector<2x8x1xf32> -> vector<2x8x1xf32>
    %233 = vector.broadcast %232 : vector<2x8x1xf32> to vector<2x8x8xf32>
    %234 = arith.mulf %231, %233 : vector<2x8x8xf32>
    %235 = vector.shape_cast %234 : vector<2x8x8xf32> to vector<16x8xf32>
    %c0_96 = arith.constant 0 : index
    %c0_97 = arith.constant 0 : index
    %236 = vector.load %arg11[%c0_96, %c0_97] : memref<16x32xf32, #tpu.memory_space<vmem>>, vector<16x8xf32>
    tpu.vector_store %arg11[%c0_96, %c0_97], %235 {strides = array<i32>} : memref<16x32xf32, #tpu.memory_space<vmem>>, vector<16x8xf32>,
    %237 = vector.extract_strided_slice %215 {offsets = [0, 0, 8], sizes = [2, 8, 8], strides = [1, 1, 1]} : vector<2x8x32xf32> to vector<2x8x8xf32>
    %238 = vector.extract_strided_slice %217 {offsets = [0, 0, 8], sizes = [2, 8, 8], strides = [1, 1, 1]} : vector<2x8x32xf32> to vector<2x8x8xf32>
    %239 = vector.extract_strided_slice %219 {offsets = [0, 0, 8], sizes = [2, 8, 8], strides = [1, 1, 1]} : vector<2x8x32xf32> to vector<2x8x8xf32>
    "tpu.trace_start"() <{level = 10 : i32, message = "bqd,bkd->bqk"}> : () -> ()
    %cst_98 = arith.constant dense<0.000000e+00> : vector<2x8x8xf32>
    %240 = tpu.matmul %237, %238, %cst_98 {dimension_numbers = #tpu.dot_dimension_numbers<[2], [2], [1], [1], [0, 0, 0, 1, 1, 1], [0], [0]>} : vector<2x8x8xf32>, vector<2x8x8xf32>, vector<2x8x8xf32> -> vector<2x8x8xf32>
    "tpu.trace_stop"() : () -> ()
    %cst_99 = arith.constant dense<0xFF800000> : vector<2x8xf32>
    %241 = vector.multi_reduction <maximumf>, %240, %cst_99 [2] : vector<2x8x8xf32> to vector<2x8xf32>
    %242 = vector.shape_cast %241 : vector<2x8xf32> to vector<2x8x1xf32>
    %243 = vector.broadcast %242 : vector<2x8x1xf32> to vector<2x8x8xf32>
    %244 = arith.subf %240, %243 : vector<2x8x8xf32>
    %245 = math.exp %244 : vector<2x8x8xf32>
    %cst_100 = arith.constant dense<0.000000e+00> : vector<2x8xf32>
    %246 = vector.multi_reduction <add>, %245, %cst_100 [2] : vector<2x8x8xf32> to vector<2x8xf32>
    %247 = vector.shape_cast %246 : vector<2x8xf32> to vector<2x8x1xf32>
    "tpu.trace_start"() <{level = 10 : i32, message = "bqk,bkd->bqd"}> : () -> ()
    %cst_101 = arith.constant dense<0.000000e+00> : vector<2x8x8xf32>
    %248 = tpu.matmul %245, %239, %cst_101 {dimension_numbers = #tpu.dot_dimension_numbers<[2], [1], [1], [2], [0, 0, 0, 1, 1, 2], [0], [0]>} : vector<2x8x8xf32>, vector<2x8x8xf32>, vector<2x8x8xf32> -> vector<2x8x8xf32>
    "tpu.trace_stop"() : () -> ()
    %249 = tpu.reciprocal %247 : vector<2x8x1xf32> -> vector<2x8x1xf32>
    %250 = vector.broadcast %249 : vector<2x8x1xf32> to vector<2x8x8xf32>
    %251 = arith.mulf %248, %250 : vector<2x8x8xf32>
    %252 = vector.shape_cast %251 : vector<2x8x8xf32> to vector<16x8xf32>
    %c0_102 = arith.constant 0 : index
    %c8_103 = arith.constant 8 : index
    %253 = vector.load %arg11[%c0_102, %c8_103] : memref<16x32xf32, #tpu.memory_space<vmem>>, vector<16x8xf32>
    tpu.vector_store %arg11[%c0_102, %c8_103], %252 {strides = array<i32>} : memref<16x32xf32, #tpu.memory_space<vmem>>, vector<16x8xf32>,
    %254 = vector.extract_strided_slice %215 {offsets = [0, 0, 16], sizes = [2, 8, 8], strides = [1, 1, 1]} : vector<2x8x32xf32> to vector<2x8x8xf32>
    %255 = vector.extract_strided_slice %217 {offsets = [0, 0, 16], sizes = [2, 8, 8], strides = [1, 1, 1]} : vector<2x8x32xf32> to vector<2x8x8xf32>
    %256 = vector.extract_strided_slice %219 {offsets = [0, 0, 16], sizes = [2, 8, 8], strides = [1, 1, 1]} : vector<2x8x32xf32> to vector<2x8x8xf32>
    "tpu.trace_start"() <{level = 10 : i32, message = "bqd,bkd->bqk"}> : () -> ()
    %cst_104 = arith.constant dense<0.000000e+00> : vector<2x8x8xf32>
    %257 = tpu.matmul %254, %255, %cst_104 {dimension_numbers = #tpu.dot_dimension_numbers<[2], [2], [1], [1], [0, 0, 0, 1, 1, 1], [0], [0]>} : vector<2x8x8xf32>, vector<2x8x8xf32>, vector<2x8x8xf32> -> vector<2x8x8xf32>
    "tpu.trace_stop"() : () -> ()
    %cst_105 = arith.constant dense<0xFF800000> : vector<2x8xf32>
    %258 = vector.multi_reduction <maximumf>, %257, %cst_105 [2] : vector<2x8x8xf32> to vector<2x8xf32>
    %259 = vector.shape_cast %258 : vector<2x8xf32> to vector<2x8x1xf32>
    %260 = vector.broadcast %259 : vector<2x8x1xf32> to vector<2x8x8xf32>
    %261 = arith.subf %257, %260 : vector<2x8x8xf32>
    %262 = math.exp %261 : vector<2x8x8xf32>
    %cst_106 = arith.constant dense<0.000000e+00> : vector<2x8xf32>
    %263 = vector.multi_reduction <add>, %262, %cst_106 [2] : vector<2x8x8xf32> to vector<2x8xf32>
    %264 = vector.shape_cast %263 : vector<2x8xf32> to vector<2x8x1xf32>
    "tpu.trace_start"() <{level = 10 : i32, message = "bqk,bkd->bqd"}> : () -> ()
    %cst_107 = arith.constant dense<0.000000e+00> : vector<2x8x8xf32>
    %265 = tpu.matmul %262, %256, %cst_107 {dimension_numbers = #tpu.dot_dimension_numbers<[2], [1], [1], [2], [0, 0, 0, 1, 1, 2], [0], [0]>} : vector<2x8x8xf32>, vector<2x8x8xf32>, vector<2x8x8xf32> -> vector<2x8x8xf32>
    "tpu.trace_stop"() : () -> ()
    %266 = tpu.reciprocal %264 : vector<2x8x1xf32> -> vector<2x8x1xf32>
    %267 = vector.broadcast %266 : vector<2x8x1xf32> to vector<2x8x8xf32>
    %268 = arith.mulf %265, %267 : vector<2x8x8xf32>
    %269 = vector.shape_cast %268 : vector<2x8x8xf32> to vector<16x8xf32>
    %c0_108 = arith.constant 0 : index
    %c16_109 = arith.constant 16 : index
    %270 = vector.load %arg11[%c0_108, %c16_109] : memref<16x32xf32, #tpu.memory_space<vmem>>, vector<16x8xf32>
    tpu.vector_store %arg11[%c0_108, %c16_109], %269 {strides = array<i32>} : memref<16x32xf32, #tpu.memory_space<vmem>>, vector<16x8xf32>,
    %271 = vector.extract_strided_slice %215 {offsets = [0, 0, 24], sizes = [2, 8, 8], strides = [1, 1, 1]} : vector<2x8x32xf32> to vector<2x8x8xf32>
    %272 = vector.extract_strided_slice %217 {offsets = [0, 0, 24], sizes = [2, 8, 8], strides = [1, 1, 1]} : vector<2x8x32xf32> to vector<2x8x8xf32>
    %273 = vector.extract_strided_slice %219 {offsets = [0, 0, 24], sizes = [2, 8, 8], strides = [1, 1, 1]} : vector<2x8x32xf32> to vector<2x8x8xf32>
    "tpu.trace_start"() <{level = 10 : i32, message = "bqd,bkd->bqk"}> : () -> ()
    %cst_110 = arith.constant dense<0.000000e+00> : vector<2x8x8xf32>
    %274 = tpu.matmul %271, %272, %cst_110 {dimension_numbers = #tpu.dot_dimension_numbers<[2], [2], [1], [1], [0, 0, 0, 1, 1, 1], [0], [0]>} : vector<2x8x8xf32>, vector<2x8x8xf32>, vector<2x8x8xf32> -> vector<2x8x8xf32>
    "tpu.trace_stop"() : () -> ()
    %cst_111 = arith.constant dense<0xFF800000> : vector<2x8xf32>
    %275 = vector.multi_reduction <maximumf>, %274, %cst_111 [2] : vector<2x8x8xf32> to vector<2x8xf32>
    %276 = vector.shape_cast %275 : vector<2x8xf32> to vector<2x8x1xf32>
    %277 = vector.broadcast %276 : vector<2x8x1xf32> to vector<2x8x8xf32>
    %278 = arith.subf %274, %277 : vector<2x8x8xf32>
    %279 = math.exp %278 : vector<2x8x8xf32>
    %cst_112 = arith.constant dense<0.000000e+00> : vector<2x8xf32>
    %280 = vector.multi_reduction <add>, %279, %cst_112 [2] : vector<2x8x8xf32> to vector<2x8xf32>
    %281 = vector.shape_cast %280 : vector<2x8xf32> to vector<2x8x1xf32>
    "tpu.trace_start"() <{level = 10 : i32, message = "bqk,bkd->bqd"}> : () -> ()
    %cst_113 = arith.constant dense<0.000000e+00> : vector<2x8x8xf32>
    %282 = tpu.matmul %279, %273, %cst_113 {dimension_numbers = #tpu.dot_dimension_numbers<[2], [1], [1], [2], [0, 0, 0, 1, 1, 2], [0], [0]>} : vector<2x8x8xf32>, vector<2x8x8xf32>, vector<2x8x8xf32> -> vector<2x8x8xf32>
    "tpu.trace_stop"() : () -> ()
    %283 = tpu.reciprocal %281 : vector<2x8x1xf32> -> vector<2x8x1xf32>
    %284 = vector.broadcast %283 : vector<2x8x1xf32> to vector<2x8x8xf32>
    %285 = arith.mulf %282, %284 : vector<2x8x8xf32>
    %286 = vector.shape_cast %285 : vector<2x8x8xf32> to vector<16x8xf32>
    %c0_114 = arith.constant 0 : index
    %c24_115 = arith.constant 24 : index
    %287 = vector.load %arg11[%c0_114, %c24_115] : memref<16x32xf32, #tpu.memory_space<vmem>>, vector<16x8xf32>
    tpu.vector_store %arg11[%c0_114, %c24_115], %286 {strides = array<i32>} : memref<16x32xf32, #tpu.memory_space<vmem>>, vector<16x8xf32>,
    %c0_116 = arith.constant 0 : index
    %c0_117 = arith.constant 0 : index
    %288 = vector.load %arg11[%c0_116, %c0_117] : memref<16x32xf32, #tpu.memory_space<vmem>>, vector<16x32xf32>
    %cst_118 = arith.constant dense<0.000000e+00> : vector<16x32xf32>
    %289 = tpu.matmul %288, %196, %cst_118 {dimension_numbers = #tpu.dot_dimension_numbers<[1], [0], [0], [1], [0, 0, 1, 1], [], []>} : vector<16x32xf32>, vector<32x32xf32>, vector<16x32xf32> -> vector<16x32xf32>
    %290 = vector.broadcast %205 : vector<1x32xf32> to vector<16x32xf32>
    %291 = arith.addf %289, %290 : vector<16x32xf32>
    %292 = arith.addf %190, %291 : vector<16x32xf32>
    %cst_119 = arith.constant dense<0.000000e+00> : vector<16xf32>
    %293 = vector.multi_reduction <add>, %292, %cst_119 [1] : vector<16x32xf32> to vector<16xf32>
    %294 = vector.shape_cast %293 : vector<16xf32> to vector<16x1xf32>
    %cst_120 = arith.constant 3.200000e+01 : f32
    %295 = vector.broadcast %cst_120 : f32 to vector<16x1xf32>
    %296 = arith.divf %294, %295 : vector<16x1xf32>
    %297 = vector.broadcast %296 : vector<16x1xf32> to vector<16x32xf32>
    %298 = arith.subf %292, %297 : vector<16x32xf32>
    %299 = arith.mulf %298, %298 : vector<16x32xf32>
    %cst_121 = arith.constant dense<0.000000e+00> : vector<16xf32>
    %300 = vector.multi_reduction <add>, %299, %cst_121 [1] : vector<16x32xf32> to vector<16xf32>
    %301 = vector.shape_cast %300 : vector<16xf32> to vector<16x1xf32>
    %cst_122 = arith.constant 3.200000e+01 : f32
    %302 = vector.broadcast %cst_122 : f32 to vector<16x1xf32>
    %303 = arith.divf %301, %302 : vector<16x1xf32>
    %304 = vector.broadcast %296 : vector<16x1xf32> to vector<16x32xf32>
    %305 = arith.subf %292, %304 : vector<16x32xf32>
    %cst_123 = arith.constant 9.99999974E-6 : f32
    %306 = vector.broadcast %cst_123 : f32 to vector<16x1xf32>
    %307 = arith.addf %303, %306 : vector<16x1xf32>
    %308 = math.rsqrt %307 : vector<16x1xf32>
    %309 = vector.broadcast %308 : vector<16x1xf32> to vector<16x32xf32>
    %310 = arith.mulf %305, %309 : vector<16x32xf32>
    %311 = vector.broadcast %206 : vector<1x32xf32> to vector<16x32xf32>
    %312 = arith.mulf %310, %311 : vector<16x32xf32>
    %313 = vector.broadcast %207 : vector<1x32xf32> to vector<16x32xf32>
    %314 = arith.addf %312, %313 : vector<16x32xf32>
    %cst_124 = arith.constant dense<0.000000e+00> : vector<16x64xf32>
    %315 = tpu.matmul %314, %198, %cst_124 {dimension_numbers = #tpu.dot_dimension_numbers<[1], [0], [0], [1], [0, 0, 1, 1], [], []>} : vector<16x32xf32>, vector<32x64xf32>, vector<16x64xf32> -> vector<16x64xf32>
    %316 = vector.broadcast %200 : vector<1x64xf32> to vector<16x64xf32>
    %317 = arith.addf %315, %316 : vector<16x64xf32>
    %318 = arith.mulf %317, %317 : vector<16x64xf32>
    %319 = arith.mulf %317, %318 : vector<16x64xf32>
    %cst_125 = arith.constant 4.471500e-02 : f32
    %320 = vector.broadcast %cst_125 : f32 to vector<16x64xf32>
    %321 = arith.mulf %320, %319 : vector<16x64xf32>
    %322 = arith.addf %317, %321 : vector<16x64xf32>
    %cst_126 = arith.constant 0.797884583 : f32
    %323 = vector.broadcast %cst_126 : f32 to vector<16x64xf32>
    %324 = arith.mulf %323, %322 : vector<16x64xf32>
    %325 = math.tanh %324 : vector<16x64xf32>
    %cst_127 = arith.constant 1.000000e+00 : f32
    %326 = vector.broadcast %cst_127 : f32 to vector<16x64xf32>
    %327 = arith.addf %326, %325 : vector<16x64xf32>
    %cst_128 = arith.constant 5.000000e-01 : f32
    %328 = vector.broadcast %cst_128 : f32 to vector<16x64xf32>
    %329 = arith.mulf %328, %327 : vector<16x64xf32>
    %330 = arith.mulf %317, %329 : vector<16x64xf32>
    %cst_129 = arith.constant dense<0.000000e+00> : vector<16x32xf32>
    %331 = tpu.matmul %330, %202, %cst_129 {dimension_numbers = #tpu.dot_dimension_numbers<[1], [0], [0], [1], [0, 0, 1, 1], [], []>} : vector<16x64xf32>, vector<64x32xf32>, vector<16x32xf32> -> vector<16x32xf32>
    %332 = vector.broadcast %210 : vector<1x32xf32> to vector<16x32xf32>
    %333 = arith.addf %331, %332 : vector<16x32xf32>
    %334 = arith.addf %314, %333 : vector<16x32xf32>
    %cst_130 = arith.constant dense<0.000000e+00> : vector<16xf32>
    %335 = vector.multi_reduction <add>, %334, %cst_130 [1] : vector<16x32xf32> to vector<16xf32>
    %336 = vector.shape_cast %335 : vector<16xf32> to vector<16x1xf32>
    %cst_131 = arith.constant 3.200000e+01 : f32
    %337 = vector.broadcast %cst_131 : f32 to vector<16x1xf32>
    %338 = arith.divf %336, %337 : vector<16x1xf32>
    %339 = vector.broadcast %338 : vector<16x1xf32> to vector<16x32xf32>
    %340 = arith.subf %334, %339 : vector<16x32xf32>
    %341 = arith.mulf %340, %340 : vector<16x32xf32>
    %cst_132 = arith.constant dense<0.000000e+00> : vector<16xf32>
    %342 = vector.multi_reduction <add>, %341, %cst_132 [1] : vector<16x32xf32> to vector<16xf32>
    %343 = vector.shape_cast %342 : vector<16xf32> to vector<16x1xf32>
    %cst_133 = arith.constant 3.200000e+01 : f32
    %344 = vector.broadcast %cst_133 : f32 to vector<16x1xf32>
    %345 = arith.divf %343, %344 : vector<16x1xf32>
    %346 = vector.broadcast %338 : vector<16x1xf32> to vector<16x32xf32>
    %347 = arith.subf %334, %346 : vector<16x32xf32>
    %cst_134 = arith.constant 9.99999974E-6 : f32
    %348 = vector.broadcast %cst_134 : f32 to vector<16x1xf32>
    %349 = arith.addf %345, %348 : vector<16x1xf32>
    %350 = math.rsqrt %349 : vector<16x1xf32>
    %351 = vector.broadcast %350 : vector<16x1xf32> to vector<16x32xf32>
    %352 = arith.mulf %347, %351 : vector<16x32xf32>
    %353 = vector.broadcast %208 : vector<1x32xf32> to vector<16x32xf32>
    %354 = arith.mulf %352, %353 : vector<16x32xf32>
    %355 = vector.broadcast %209 : vector<1x32xf32> to vector<16x32xf32>
    %356 = arith.addf %354, %355 : vector<16x32xf32>
    %c0_135 = arith.constant 0 : index
    %c0_136 = arith.constant 0 : index
    %357 = vector.load %arg10[%c0_135, %c0_136] : memref<16x32xf32, #tpu.memory_space<vmem>>, vector<16x32xf32>
    tpu.vector_store %arg10[%c0_135, %c0_136], %356 {strides = array<i32>} : memref<16x32xf32, #tpu.memory_space<vmem>>, vector<16x32xf32>,
    return
  }
  func.func @transform_0(%arg0: i32) -> (i32, i32) {
    %c0_i32 = arith.constant 0 : i32
    %c0_i32_0 = arith.constant 0 : i32
    %c0_i32_1 = arith.constant 0 : i32
    return %c0_i32, %c0_i32_0 : i32, i32
  }
  func.func @transform_1(%arg0: i32) -> (i32, i32) {
    %c0_i32 = arith.constant 0 : i32
    %c0_i32_0 = arith.constant 0 : i32
    %c0_i32_1 = arith.constant 0 : i32
    return %c0_i32, %c0_i32_0 : i32, i32
  }
  func.func @transform_2(%arg0: i32) -> (i32, i32, i32) {
    %c0_i32 = arith.constant 0 : i32
    %c0_i32_0 = arith.constant 0 : i32
    %c0_i32_1 = arith.constant 0 : i32
    %c0_i32_2 = arith.constant 0 : i32
    return %c0_i32, %c0_i32_0, %c0_i32_1 : i32, i32, i32
  }
  func.func @transform_3(%arg0: i32) -> (i32, i32, i32) {
    %c0_i32 = arith.constant 0 : i32
    %c0_i32_0 = arith.constant 0 : i32
    %c0_i32_1 = arith.constant 0 : i32
    %c0_i32_2 = arith.constant 0 : i32
    return %c0_i32, %c0_i32_0, %c0_i32_1 : i32, i32, i32
  }
  func.func @transform_4(%arg0: i32) -> (i32, i32, i32) {
    %c0_i32 = arith.constant 0 : i32
    %c0_i32_0 = arith.constant 0 : i32
    %c0_i32_1 = arith.constant 0 : i32
    %c0_i32_2 = arith.constant 0 : i32
    return %c0_i32, %c0_i32_0, %c0_i32_1 : i32, i32, i32
  }
  func.func @transform_5(%arg0: i32) -> (i32, i32, i32) {
    %c0_i32 = arith.constant 0 : i32
    %c0_i32_0 = arith.constant 0 : i32
    %c0_i32_1 = arith.constant 0 : i32
    %c0_i32_2 = arith.constant 0 : i32
    return %c0_i32, %c0_i32_0, %c0_i32_1 : i32, i32, i32
  }
  func.func @transform_6(%arg0: i32) -> (i32, i32, i32) {
    %c0_i32 = arith.constant 0 : i32
    %c0_i32_0 = arith.constant 0 : i32
    %c0_i32_1 = arith.constant 0 : i32
    %c0_i32_2 = arith.constant 0 : i32
    return %c0_i32, %c0_i32_0, %c0_i32_1 : i32, i32, i32
  }
  func.func @transform_7(%arg0: i32) -> (i32, i32, i32) {
    %c0_i32 = arith.constant 0 : i32
    %c0_i32_0 = arith.constant 0 : i32
    %c0_i32_1 = arith.constant 0 : i32
    %c0_i32_2 = arith.constant 0 : i32
    return %c0_i32, %c0_i32_0, %c0_i32_1 : i32, i32, i32
  }
  func.func @transform_8(%arg0: i32) -> (i32, i32, i32) {
    %c0_i32 = arith.constant 0 : i32
    %c0_i32_0 = arith.constant 0 : i32
    %c0_i32_1 = arith.constant 0 : i32
    %c0_i32_2 = arith.constant 0 : i32
    return %c0_i32, %c0_i32_0, %c0_i32_1 : i32, i32, i32
  }
  func.func @transform_9(%arg0: i32) -> (i32, i32) {
    %c0_i32 = arith.constant 0 : i32
    %c0_i32_0 = arith.constant 0 : i32
    %c0_i32_1 = arith.constant 0 : i32
    return %c0_i32, %c0_i32_0 : i32, i32
  }
}

</mosaic_0001>

<bundles_post_ra>
// kernel: tpu_custom_call.1
= control target key start
LH: loop header
LB: loop body
LE: loop exit
PB: predicated region body
PF: predicated region fallthrough
CT: control target
= control target key end

     0   :  { %vm37_vm0 = vcmask 261120   ;;  %s5131_s0 = inlined_call_operand.vmem [shape: f32[16,32], index: 0, kind: input, shape index: {}]   ;;  %s5132_s1 = inlined_call_operand.vmem [shape: f32[2,32], index: 1, kind: input, shape index: {}]   ;;  %s5133_s2 = inlined_call_operand.vmem [shape: f32[2,32,96], index: 2, kind: input, shape index: {}]   ;;  %s5134_s3 = inlined_call_operand.vmem [shape: f32[2,1,96], index: 3, kind: input, shape index: {}]   ;;  %s5135_s4 = inlined_call_operand.vmem [shape: f32[2,32,32], index: 4, kind: input, shape index: {}]   ;;  %s5136_s5 = inlined_call_operand.vmem [shape: f32[2,32,64], index: 5, kind: input, shape index: {}]   ;;  %s5137_s6 = inlined_call_operand.vmem [shape: f32[2,1,64], index: 6, kind: input, shape index: {}]   ;;  %s5138_s7 = inlined_call_operand.vmem [shape: f32[2,64,32], index: 7, kind: input, shape index: {}]   ;;  %s5139_s8 = inlined_call_operand.vmem [shape: f32[2,6,32], index: 8, kind: input, shape index: {}]   ;;  %s5140_s9 = inlined_call_operand.hbm [shape: f32[16,32], index: 9, kind: output, shape index: {}]  }
   0x1   :  { %v33_v0 = vld [vmem:[%s5131_s0] sm:$0xff]  ;;  %v34_v1 = vld [vmem:[%s5131_s0 + $0x8] sm:$0xff] }
   0x2   :  { %14 = vsyncpa [#allocation4], 0  ;;  %v38_v2 = vsel %vm37_vm0, %v33_v0, 0.0  ;;  %v41_v3 = vsel %vm37_vm0, %v34_v1, 0.0  ;;  %v77_v14 = vld [vmem:[%s5133_s2] sm:$0xff]  ;;  %v78_v15 = vld [vmem:[%s5133_s2 + $0x8] sm:$0xff] }
   0x3   :  { %39 = vadd.xlane.f32.xlu0 %v38_v2  ;;  %v79_v16 = vld [vmem:[%s5133_s2 + $0x10] sm:$0xff]  ;;  %v4218_v17 = vpack.c.bf16 %v78_v15, %v77_v14  ;;  %v80_v18 = vld [vmem:[%s5133_s2 + $0x18] sm:$0xff]  ;;  %v3741_v27 = vld [vmem:[%s5132_s1] ss:$0 sm:$0xff]  ;;  %v4432_v36 = vmov 0.0   ;;  %vm4433_vm1 = vmmov 0  }
   0x4   :  { %v4222_v19 = vpack.c.bf16 %v80_v18, %v79_v16  ;;  %v3742_v29 = vld [vmem:[%s5132_s1 + $0x1] ss:$0 sm:$0xff]  ;;  %3975 = vmatprep.subr.mxu0 %v4432_v36  ;;  %3977 = vmatprep.mubr.msk.f32.mxu0 %vm4433_vm1, %v4432_v36  ;;  %v3743_v37 = vld [vmem:[%s5134_s3] ss:$0 sm:$0xff]  ;;  %s4434_s25 = smov 96   ;;  %vm190_vm2 = vcmask 64512  }
   0x5   :  { %4219 = vmatprep.subr.bf16.mxu1 %v4218_v17  ;;  %s4435_s26 = smov 64   ;;  %s4436_s27 = smov 88   ;;  %vm856_vm3 = vcmask 130112   ;;  %vm1197_vm4 = vcmask 195712   ;;  %vm1538_vm5 = vcmask 261312   ;;  %vm1777_vm6 = vcmask 523264  }
   0x6   :  { %4221 = vmatpush3.bf16.msra.mxu1 %v4218_v17  ;;  %s4437_s28 = smov 120   ;;  %s4438_s29 = smov 56  }
   0x7   :  { %42 = vadd.xlane.f32.xlu0 %v41_v3  ;;  %4223 = vmatprep.subr.bf16.mxu1 %v4222_v19  ;;  %s4439_s30 = smov 80   ;;  %s4440_s10 = smov 112  }
   0x8   :  { %s4441_s11 = smov 48   ;;  %s4442_s12 = smov 72  }
   0x9   :  { %s4443_s0 = smov 104   ;;  %s4444_s13 = smov 40  }
   0xa   :  { %4225 = vmatpush3.bf16.msra.mxu1 %v4222_v19  ;;  %s4445_s14 = smov 8   ;;  %s4446_s15 = smov 16  }
   0xb   :  { %3965 = vmatprep.subr.mxu1 %v4432_v36  ;;  %s4447_s1 = smov 24  }
  0x90   :  { %v40_v4 = vpop.xlane.xlu0 %39 }
  0x91   :  { %v45_v5 = vmul.f32 0.03125, %v40_v4 }
  0x93   :  { %v47_v6 = vsub.f32 %v33_v0, %v45_v5 }
  0x94   :  { %v43_v7 = vpop.xlane.xlu0 %42 }
  0x95   :  { %v46_v8 = vmul.f32 0.03125, %v43_v7  ;;  %v49_v9 = vmul.f32 %v47_v6, %v47_v6 }
  0x97   :  { %v48_v10 = vsub.f32 %v34_v1, %v46_v8  ;;  %v51_v11 = vsel %vm37_vm0, %v49_v9, 0.0 }
  0x98   :  { %52 = vadd.xlane.f32.xlu1 %v51_v11 }
  0x99   :  { %v50_v12 = vmul.f32 %v48_v10, %v48_v10 }
  0x9b   :  { %v54_v13 = vsel %vm37_vm0, %v50_v12, 0.0 }
  0x9c   :  { %55 = vadd.xlane.f32.xlu1 %v54_v13 }
 0x125   :  { %v53_v20 = vpop.xlane.xlu1 %52 }
 0x126   :  { %v57_v21 = vmul.f32 0.03125, %v53_v20 }
 0x128   :  { %v59_v22 = vadd.f32 1e-05, %v57_v21 }
 0x129   :  { %v56_v23 = vpop.xlane.xlu1 %55 }
 0x12a   :  { %4316 = vrsqrt.f32 %v59_v22  ;;  %v58_v24 = vmul.f32 0.03125, %v56_v23 }
 0x12c   :  { %v60_v25 = vadd.f32 1e-05, %v58_v24 }
 0x12e   :  { %4318 = vrsqrt.f32 %v60_v25 }
 0x134   :  { %v4317_v26 = vpop.eup %4316 }
 0x135   :  { %v63_v28 = vmul.f32 %v4317_v26, %v47_v6 }
 0x137   :  { %v69_v30 = vmul.f32 %v3741_v27, %v63_v28 }
 0x138   :  { %v4319_v31 = vpop.eup %4318 }
 0x139   :  { %v64_v32 = vmul.f32 %v4319_v31, %v48_v10  ;;  %v4528_v33 = vadd.f32 %v3742_v29, %v69_v30 }
 0x13b   :  { %v70_v34 = vmul.f32 %v3741_v27, %v64_v32  ;;  %3962 = vmatprep.mubr.msk.f32.mxu1 %vm37_vm0, %v4528_v33 }
 0x13d   :  { %v4532_v35 = vadd.f32 %v3742_v29, %v70_v34 }
 0x13f   :  { %3963 = vmatmul.mubr.msk.f32.vlgmr.msra.gmra.mrb[0].mxu1 %vm37_vm0, %v4532_v35 }
 0x140   :  { %3967 = vmatprep.mubr.msk.f32.mxu1 %vm4433_vm1, %v4432_v36 }
 0x212   :  { %v3964_v38 = vpop.f32.mrb[0].mxu1 }
 0x213   :  { %v4545_v39 = vadd.f32 %v3964_v38, %v3743_v37  ;;  %v178_v40 = vpop.f32.mrb[1].mxu1 }
 0x214   :  { %v4547_v41 = vadd.f32 %v3743_v37, %v178_v40 }
 0x215   :  { %266 = vrot.lane.b32.xlu1 %v4545_v39, %s4434_s25 }
 0x216   :  { %188 = vrot.lane.b32.xlu0 %v4547_v41, %s4434_s25 }
 0x287   :  { %v267_v43 = vpop.permute.xlu1 %266 }
 0x288   :  { %v189_v42 = vpop.permute.xlu0 %188 }
 0x289   :  { %3966 = vmatpush3.xpose.msk.msra.mxu1 %vm190_vm2, %v189_v42 }
 0x28a   :  { %3970 = vmatprep.subr.mxu1 %v4432_v36 }
 0x28c   :  { %3968 = vmatmul.mubr.msk.f32.vlgmr.msra.gmra.mrb[2].mxu1 %vm190_vm2, %v4547_v41 }
 0x28d   :  { %3971 = vmatpush3.xpose.msk.msra.mxu1 %vm190_vm2, %v267_v43  ;;  %3972 = vmatprep.mubr.msk.f32.mxu1 %vm4433_vm1, %v4432_v36 }
 0x28e   :  { %3980 = vmatprep.subr.mxu1 %v4432_v36 }
 0x290   :  { %3973 = vmatmul.mubr.msk.f32.vlgmr.msra.gmra.mrb[4].mxu1 %vm190_vm2, %v4545_v39 }
 0x291   :  { %3982 = vmatprep.mubr.msk.f32.mxu1 %vm4433_vm1, %v4432_v36 }
 0x35f   :  { %v261_v44 = vpop.f32.mrb[2].mxu1 }
 0x360   :  { %v3969_v45 = vpop.f32.mrb[3].mxu1  ;;  %v342_v46 = vsel %vm190_vm2, %v261_v44, -inf }
 0x361   :  { %343 = vmax.xlane.f32.xlu1 %v342_v46 }
 0x363   :  { %v338_v47 = vpop.f32.mrb[4].mxu1 }
 0x364   :  { %v3974_v48 = vpop.f32.mrb[5].mxu1  ;;  %v345_v49 = vsel %vm190_vm2, %v338_v47, -inf }
 0x365   :  { %346 = vmax.xlane.f32.xlu0 %v345_v49 }
 0x372   :  { %436 = vrot.lane.b32.xlu1 %v4545_v39, %s4435_s26 }
 0x376   :  { %520 = vrot.lane.b32.xlu1 %v4547_v41, %s4436_s27 }
 0x37a   :  { %598 = vrot.lane.b32.xlu1 %v4545_v39, %s4436_s27 }
 0x37b   :  { %360 = vrot.lane.b32.xlu0 %v4547_v41, %s4435_s26 }
 0x37e   :  { %596 = vrot.lane.b32.xlu1 %v4545_v39, %s4437_s28 }
 0x37f   :  { %518 = vrot.lane.b32.xlu0 %v4547_v41, %s4437_s28 }
 0x382   :  { %768 = vrot.lane.b32.xlu1 %v4545_v39, %s4438_s29 }
 0x383   :  { %692 = vrot.lane.b32.xlu0 %v4547_v41, %s4438_s29 }
 0x386   :  { %939 = vrot.lane.b32.xlu1 %v4545_v39, %s4439_s30 }
 0x3ee   :  { %v344_v50 = vpop.xlane.xlu1 %343 }
 0x3ef   :  { %v348_v51 = vsub.f32 %v261_v44, %v344_v50 }
 0x3f1   :  { %v350_v52 = vmul.f32 1.442695, %v348_v51 }
 0x3f2   :  { %v437_v53 = vpop.permute.xlu1 %436  ;;  %v347_v54 = vpop.xlane.xlu0 %346 }
 0x3f3   :  { %4320 = vpow2.f32 %v350_v52  ;;  %v349_v55 = vsub.f32 %v338_v47, %v347_v54  ;;  %3981 = vmatpush3.msra.mxu1 %v437_v53 }
 0x3f4   :  { %3990 = vmatprep.subr.mxu1 %v4432_v36 }
 0x3f5   :  { %v352_v56 = vmul.f32 1.442695, %v349_v55 }
 0x3f6   :  { %v521_v57 = vpop.permute.xlu1 %520  ;;  %v361_v58 = vpop.permute.xlu0 %360 }
 0x3f7   :  { %4322 = vpow2.f32 %v352_v56  ;;  %3976 = vmatpush3.msra.mxu0 %v361_v58 }
 0x3f8   :  { %3985 = vmatprep.subr.mxu0 %v4432_v36 }
 0x3fa   :  { %v599_v59 = vpop.permute.xlu1 %598  ;;  %v519_v60 = vpop.permute.xlu0 %518 }
 0x3fd   :  { %v4587_v61 = vpop.eup %4320 }
 0x3fe   :  { %3978 = vmatmul.mubr.msk.f32.vlgmr.msra.gmra.mrb[0].mxu0 %vm190_vm2, %v4587_v61  ;;  %v597_v62 = vpop.permute.xlu1 %596  ;;  %v693_v0 = vpop.permute.xlu0 %692 }
 0x3ff   :  { %3986 = vmatpush3.xpose.msk.msra.mxu0 %vm190_vm2, %v521_v57  ;;  %3987 = vmatprep.mubr.msk.f32.mxu0 %vm4433_vm1, %v4432_v36 }
 0x400   :  { %3995 = vmatprep.subr.mxu0 %v4432_v36 }
 0x401   :  { %v4595_v63 = vpop.eup %4322 }
 0x402   :  { %3983 = vmatmul.mubr.msk.f32.vlgmr.msra.gmra.mrb[6].mxu1 %vm190_vm2, %v4595_v63  ;;  %3988 = vmatmul.mubr.msk.f32.vlgmr.msra.gmra.mrb[2].mxu0 %vm190_vm2, %v519_v60  ;;  %v769_v1 = vpop.permute.xlu1 %768 }
 0x403   :  { %3991 = vmatpush3.xpose.msk.msra.mxu1 %vm190_vm2, %v599_v59  ;;  %3996 = vmatpush3.msra.mxu0 %v693_v0 }
 0x404   :  { %3992 = vmatprep.mubr.msk.f32.mxu1 %vm4433_vm1, %v4432_v36  ;;  %4000 = vmatprep.subr.mxu1 %v4432_v36 }
 0x405   :  { %3997 = vmatprep.mubr.msk.f32.mxu0 %vm4433_vm1, %v4432_v36  ;;  %4005 = vmatprep.subr.mxu0 %v4432_v36 }
 0x406   :  { %3993 = vmatmul.mubr.msk.f32.vlgmr.msra.gmra.mrb[8].mxu1 %vm190_vm2, %v597_v62  ;;  %v940_v12 = vpop.permute.xlu1 %939 }
 0x407   :  { %4001 = vmatpush3.msra.mxu1 %v769_v1  ;;  %4002 = vmatprep.mubr.msk.f32.mxu1 %vm4433_vm1, %v4432_v36 }
 0x408   :  { %4010 = vmatprep.subr.mxu1 %v4432_v36 }
 0x4d1   :  { %v4611_v2 = vpop.f32.mrb[0].mxu0 }
 0x4d2   :  { %v3979_v3 = vpop.f32.mrb[1].mxu0 }
 0x4d5   :  { %v4613_v4 = vpop.f32.mrb[6].mxu1  ;;  %v592_v5 = vpop.f32.mrb[2].mxu0 }
 0x4d6   :  { %v3984_v6 = vpop.f32.mrb[7].mxu1  ;;  %v3989_v7 = vpop.f32.mrb[3].mxu0  ;;  %v674_v8 = vsel %vm190_vm2, %v592_v5, -inf }
 0x4d7   :  { %675 = vmax.xlane.f32.xlu0 %v674_v8 }
 0x4d9   :  { %v670_v9 = vpop.f32.mrb[8].mxu1 }
 0x4da   :  { %v3994_v10 = vpop.f32.mrb[9].mxu1  ;;  %v677_v11 = vsel %vm190_vm2, %v670_v9, -inf }
 0x4db   :  { %678 = vmax.xlane.f32.xlu1 %v677_v11 }
 0x4ec   :  { %937 = vrot.lane.b32.xlu1 %v4545_v39, %s4440_s10 }
 0x4ed   :  { %861 = vrot.lane.b32.xlu0 %v4547_v41, %s4439_s30 }
 0x4f0   :  { %1109 = vrot.lane.b32.xlu1 %v4545_v39, %s4441_s11 }
 0x4f1   :  { %859 = vrot.lane.b32.xlu0 %v4547_v41, %s4440_s10 }
 0x4f4   :  { %1280 = vrot.lane.b32.xlu1 %v4545_v39, %s4442_s12 }
 0x4f5   :  { %1033 = vrot.lane.b32.xlu0 %v4547_v41, %s4441_s11 }
 0x564   :  { %v676_v13 = vpop.xlane.xlu0 %675 }
 0x565   :  { %v680_v14 = vsub.f32 %v592_v5, %v676_v13 }
 0x567   :  { %v682_v15 = vmul.f32 1.442695, %v680_v14 }
 0x568   :  { %v679_v16 = vpop.xlane.xlu1 %678  ;;  %v862_v19 = vpop.permute.xlu0 %861 }
 0x569   :  { %4324 = vpow2.f32 %v682_v15  ;;  %v681_v17 = vsub.f32 %v670_v9, %v679_v16  ;;  %v354_v16 = vsel %vm190_vm2, %v4587_v61, 0.0 }
 0x56b   :  { %v684_v18 = vmul.f32 1.442695, %v681_v17 }
 0x56c   :  { %v860_v20 = vpop.permute.xlu0 %859  ;;  %v938_v22 = vpop.permute.xlu1 %937 }
 0x56d   :  { %4326 = vpow2.f32 %v684_v18  ;;  %v357_v18 = vsel %vm190_vm2, %v4595_v63, 0.0 }
 0x570   :  { %v1034_v24 = vpop.permute.xlu0 %1033  ;;  %v1110_v25 = vpop.permute.xlu1 %1109 }
 0x573   :  { %v4629_v21 = vpop.eup %4324 }
 0x574   :  { %3998 = vmatmul.mubr.msk.f32.vlgmr.msra.gmra.mrb[4].mxu0 %vm190_vm2, %v4629_v21  ;;  %v1281_v40 = vpop.permute.xlu1 %1280  ;;  %v686_v1 = vsel %vm190_vm2, %v4629_v21, 0.0 }
 0x575   :  { %4006 = vmatpush3.xpose.msk.msra.mxu0 %vm190_vm2, %v862_v19  ;;  %4007 = vmatprep.mubr.msk.f32.mxu0 %vm4433_vm1, %v4432_v36 }
 0x576   :  { %4015 = vmatprep.subr.mxu0 %v4432_v36 }
 0x577   :  { %v4637_v23 = vpop.eup %4326 }
 0x578   :  { %4003 = vmatmul.mubr.msk.f32.vlgmr.msra.gmra.mrb[10].mxu1 %vm190_vm2, %v4637_v23  ;;  %4008 = vmatmul.mubr.msk.f32.vlgmr.msra.gmra.mrb[6].mxu0 %vm190_vm2, %v860_v20  ;;  %v689_v5 = vsel %vm190_vm2, %v4637_v23, 0.0 }
 0x579   :  { %4011 = vmatpush3.xpose.msk.msra.mxu1 %vm190_vm2, %v940_v12  ;;  %4016 = vmatpush3.msra.mxu0 %v1034_v24 }
 0x57a   :  { %4012 = vmatprep.mubr.msk.f32.mxu1 %vm4433_vm1, %v4432_v36  ;;  %4020 = vmatprep.subr.mxu1 %v4432_v36 }
 0x57b   :  { %4017 = vmatprep.mubr.msk.f32.mxu0 %vm4433_vm1, %v4432_v36  ;;  %4025 = vmatprep.subr.mxu0 %v4432_v36 }
 0x57c   :  { %4013 = vmatmul.mubr.msk.f32.vlgmr.msra.gmra.mrb[12].mxu1 %vm190_vm2, %v938_v22 }
 0x57d   :  { %4021 = vmatpush3.msra.mxu1 %v1110_v25  ;;  %4022 = vmatprep.mubr.msk.f32.mxu1 %vm4433_vm1, %v4432_v36 }
 0x57e   :  { %4030 = vmatprep.subr.mxu1 %v4432_v36 }
 0x647   :  { %v4653_v26 = vpop.f32.mrb[4].mxu0 }
 0x648   :  { %v3999_v27 = vpop.f32.mrb[5].mxu0 }
 0x64b   :  { %v4655_v28 = vpop.f32.mrb[10].mxu1  ;;  %v933_v29 = vpop.f32.mrb[6].mxu0 }
 0x64c   :  { %v4004_v30 = vpop.f32.mrb[11].mxu1  ;;  %v4009_v31 = vpop.f32.mrb[7].mxu0  ;;  %v1015_v32 = vsel %vm190_vm2, %v933_v29, -inf }
 0x64d   :  { %1016 = vmax.xlane.f32.xlu0 %v1015_v32 }
 0x64f   :  { %v1011_v34 = vpop.f32.mrb[12].mxu1 }
 0x650   :  { %v4014_v37 = vpop.f32.mrb[13].mxu1  ;;  %v1018_v38 = vsel %vm190_vm2, %v1011_v34, -inf }
 0x651   :  { %1019 = vmax.xlane.f32.xlu1 %v1018_v38 }
 0x662   :  { %1278 = vrot.lane.b32.xlu1 %v4545_v39, %s4443_s0 }
 0x663   :  { %1202 = vrot.lane.b32.xlu0 %v4547_v41, %s4442_s12 }
 0x667   :  { %1200 = vrot.lane.b32.xlu0 %v4547_v41, %s4443_s0 }
 0x6da   :  { %v1017_v42 = vpop.xlane.xlu0 %1016 }
 0x6db   :  { %v1021_v43 = vsub.f32 %v933_v29, %v1017_v42 }
 0x6dd   :  { %v1023_v44 = vmul.f32 1.442695, %v1021_v43 }
 0x6de   :  { %v1020_v45 = vpop.xlane.xlu1 %1019  ;;  %v1203_v48 = vpop.permute.xlu0 %1202 }
 0x6df   :  { %4328 = vpow2.f32 %v1023_v44  ;;  %v1022_v46 = vsub.f32 %v1011_v34, %v1020_v45 }
 0x6e1   :  { %v1025_v47 = vmul.f32 1.442695, %v1022_v46 }
 0x6e2   :  { %v1201_v51 = vpop.permute.xlu0 %1200  ;;  %v1279_v52 = vpop.permute.xlu1 %1278 }
 0x6e3   :  { %4330 = vpow2.f32 %v1025_v47  ;;  %v84_v47 = vld [vmem:[%s5135_s4 + $0x10] sm:$0xff] }
 0x6e9   :  { %v4329_v49 = vpop.eup %4328 }
 0x6ea   :  { %4018 = vmatmul.mubr.msk.f32.vlgmr.msra.gmra.mrb[8].mxu0 %vm190_vm2, %v4329_v49  ;;  %v1027_v3 = vsel %vm190_vm2, %v4329_v49, 0.0 }
 0x6eb   :  { %4026 = vmatpush3.xpose.msk.msra.mxu0 %vm190_vm2, %v1203_v48  ;;  %4027 = vmatprep.mubr.msk.f32.mxu0 %vm4433_vm1, %v4432_v36  ;;  %v85_v48 = vld [vmem:[%s5135_s4 + $0x18] sm:$0xff] }
 0x6ec   :  { %4035 = vmatprep.subr.mxu0 %v4432_v36  ;;  %v4230_v49 = vpack.c.bf16 %v85_v48, %v84_v47  ;;  %v92_v47 = vld [vmem:[%s5138_s7 + $0x8] sm:$0xff] }
 0x6ed   :  { %v4331_v50 = vpop.eup %4330 }
 0x6ee   :  { %4023 = vmatmul.mubr.msk.f32.vlgmr.msra.gmra.mrb[14].mxu1 %vm190_vm2, %v4331_v50  ;;  %4028 = vmatmul.mubr.msk.f32.vlgmr.msra.gmra.mrb[10].mxu0 %vm190_vm2, %v1201_v51  ;;  %v1030_v6 = vsel %vm190_vm2, %v4331_v50, 0.0 }
 0x6ef   :  { %4031 = vmatpush3.xpose.msk.msra.mxu1 %vm190_vm2, %v1281_v40  ;;  %4032 = vmatprep.mubr.msk.f32.mxu1 %vm4433_vm1, %v4432_v36 }
 0x6f0   :  { %4040 = vmatprep.subr.mxu1 %v4432_v36  ;;  %4037 = vmatprep.mubr.msk.f32.mxu0 %vm4433_vm1, %v4432_v36 }
 0x6f2   :  { %4033 = vmatmul.mubr.msk.f32.vlgmr.msra.gmra.mrb[16].mxu1 %vm190_vm2, %v1279_v52 }
 0x6f3   :  { %4042 = vmatprep.mubr.msk.f32.mxu1 %vm4433_vm1, %v4432_v36 }
 0x7bd   :  { %v4681_v53 = vpop.f32.mrb[8].mxu0 }
 0x7be   :  { %v4019_v54 = vpop.f32.mrb[9].mxu0 }
 0x7c1   :  { %v4683_v55 = vpop.f32.mrb[14].mxu1  ;;  %v1274_v56 = vpop.f32.mrb[10].mxu0 }
 0x7c2   :  { %v4024_v57 = vpop.f32.mrb[15].mxu1  ;;  %v4029_v58 = vpop.f32.mrb[11].mxu0  ;;  %v1356_v59 = vsel %vm190_vm2, %v1274_v56, -inf }
 0x7c3   :  { %1357 = vmax.xlane.f32.xlu0 %v1356_v59 }
 0x7c5   :  { %v1352_v60 = vpop.f32.mrb[16].mxu1 }
 0x7c6   :  { %v4034_v62 = vpop.f32.mrb[17].mxu1  ;;  %v1359_v0 = vsel %vm190_vm2, %v1352_v60, -inf }
 0x7c7   :  { %1360 = vmax.xlane.f32.xlu1 %v1359_v0  ;;  %v1543_v0 = vlaneseq }
 0x7d8   :  { %1450 = vrot.lane.b32.xlu1 %v4545_v39, %s4444_s13 }
 0x7d9   :  { %1374 = vrot.lane.b32.xlu0 %v4547_v41, %s4444_s13 }
 0x7f8   :  { %687 = vadd.xlane.f32.xlu0 %v686_v1  ;;  %v4739_v1 = vshrl.u32 %v1543_v0, 7 }
 0x7fc   :  { %1028 = vadd.xlane.f32.xlu0 %v1027_v3  ;;  %690 = vadd.xlane.f32.xlu1 %v689_v5  ;;  %v1545_v3 = vsub.s32 0, %v4739_v1  ;;  %v4745_v5 = vld [vmem:[%s5139_s8] sm:$0x3f] }
 0x800   :  { %1031 = vadd.xlane.f32.xlu0 %v1030_v6  ;;  %v1546_v6 = vrot.slane %v4745_v5, %v1545_v3 }
 0x850   :  { %v1358_v7 = vpop.xlane.xlu0 %1357 }
 0x851   :  { %v1362_v8 = vsub.f32 %v1274_v56, %v1358_v7 }
 0x853   :  { %v1364_v39 = vmul.f32 1.442695, %v1362_v8 }
 0x854   :  { %v1375_v9 = vpop.permute.xlu0 %1374  ;;  %v1361_v10 = vpop.xlane.xlu1 %1360 }
 0x855   :  { %4332 = vpow2.f32 %v1364_v39  ;;  %v1363_v41 = vsub.f32 %v1352_v60, %v1361_v10  ;;  %4036 = vmatpush3.msra.mxu0 %v1375_v9 }
 0x857   :  { %v1366_v11 = vmul.f32 1.442695, %v1363_v41 }
 0x858   :  { %v1451_v12 = vpop.permute.xlu1 %1450 }
 0x859   :  { %4334 = vpow2.f32 %v1366_v11  ;;  %4041 = vmatpush3.msra.mxu1 %v1451_v12 }
 0x85f   :  { %v4333_v13 = vpop.eup %4332 }
 0x860   :  { %4038 = vmatmul.mubr.msk.f32.vlgmr.msra.gmra.mrb[12].mxu0 %vm190_vm2, %v4333_v13  ;;  %v1368_v14 = vsel %vm190_vm2, %v4333_v13, 0.0 }
 0x861   :  { %1369 = vadd.xlane.f32.xlu0 %v1368_v14 }
 0x863   :  { %v4335_v15 = vpop.eup %4334 }
 0x864   :  { %4043 = vmatmul.mubr.msk.f32.vlgmr.msra.gmra.mrb[18].mxu1 %vm190_vm2, %v4335_v15  ;;  %v1371_v17 = vsel %vm190_vm2, %v4335_v15, 0.0 }
 0x865   :  { %355 = vadd.xlane.f32.xlu0 %v354_v16  ;;  %1372 = vadd.xlane.f32.xlu1 %v1371_v17 }
 0x869   :  { %358 = vadd.xlane.f32.xlu1 %v357_v18 }
 0x885   :  { %v688_v19 = vpop.xlane.xlu0 %687 }
 0x886   :  { %4336 = vrcp.f32 %v688_v19 }
 0x889   :  { %v1029_v20 = vpop.xlane.xlu0 %1028  ;;  %v691_v21 = vpop.xlane.xlu1 %690 }
 0x88a   :  { %4338 = vrcp.f32 %v691_v21 }
 0x88b   :  { %4340 = vrcp.f32 %v1029_v20 }
 0x88d   :  { %v1032_v22 = vpop.xlane.xlu0 %1031 }
 0x88e   :  { %4342 = vrcp.f32 %v1032_v22  ;;  %v87_v22 = vld [vmem:[%s5136_s5 + $0x8] sm:$0xff] }
 0x890   :  { %v4337_v23 = vpop.eup %4336 }
 0x891   :  { %v846_v24 = vmul.f32 %v4337_v23, %v4653_v26 }
 0x893   :  { %850 = vrot.lane.b32.xlu0 %v846_v24, %s4445_s14  ;;  %v88_v24 = vld [vmem:[%s5136_s5 + $0x10] sm:$0xff] }
 0x894   :  { %v4339_v61 = vpop.eup %4338 }
 0x895   :  { %v847_v25 = vmul.f32 %v4339_v61, %v4655_v28  ;;  %v4341_v27 = vpop.eup %4340  ;;  %v89_v61 = vld [vmem:[%s5136_s5 + $0x18] sm:$0xff] }
 0x896   :  { %v1187_v63 = vmul.f32 %v4341_v27, %v4681_v53 }
 0x897   :  { %852 = vrot.lane.b32.xlu1 %v847_v25, %s4445_s14  ;;  %v4238_v25 = vpack.c.bf16 %v89_v61, %v88_v24 }
 0x898   :  { %v4343_v29 = vpop.eup %4342 }
 0x899   :  { %v1188_v30 = vmul.f32 %v4343_v29, %v4683_v55 }
 0x89b   :  { %1191 = vrot.lane.b32.xlu1 %v1187_v63, %s4446_s15 }
 0x89f   :  { %1193 = vrot.lane.b32.xlu1 %v1188_v30, %s4446_s15 }
 0x8ee   :  { %v1370_v26 = vpop.xlane.xlu0 %1369 }
 0x8f2   :  { %v356_v31 = vpop.xlane.xlu0 %355  ;;  %v1373_v32 = vpop.xlane.xlu1 %1372 }
 0x8f3   :  { %4344 = vrcp.f32 %v356_v31 }
 0x8f6   :  { %v359_v34 = vpop.xlane.xlu1 %358 }
 0x8f7   :  { %4346 = vrcp.f32 %v359_v34  ;;  %v1664_v34 = vsub.s32 2, %v4739_v1 }
 0x8f8   :  { %4348 = vrcp.f32 %v1370_v26 }
 0x8f9   :  { %4350 = vrcp.f32 %v1373_v32  ;;  %v1658_v32 = vsub.s32 1, %v4739_v1 }
 0x8fd   :  { %v4345_v28 = vpop.eup %4344 }
 0x8fe   :  { %v514_v37 = vmul.f32 %v4345_v28, %v4611_v2  ;;  %v82_v2 = vld [vmem:[%s5135_s4] sm:$0xff]  ;;  %v1659_v28 = vrot.slane %v4745_v5, %v1658_v32 }
 0x900   :  { %516 = vst.msk [vmem:[#allocation2] sm:$0xff] %vm190_vm2, %v514_v37 }
 0x901   :  { %v4347_v38 = vpop.eup %4346 }
 0x902   :  { %v515_v40 = vmul.f32 %v4347_v38, %v4613_v4  ;;  %v83_v4 = vld [vmem:[%s5135_s4 + $0x8] sm:$0xff]  ;;  %v4349_v50 = vpop.eup %4348 }
 0x903   :  { %v4226_v46 = vpack.c.bf16 %v83_v4, %v82_v2  ;;  %v4351_v54 = vpop.eup %4350 }
 0x904   :  { %517 = vst.msk [vmem:[#allocation2 + $0x8] sm:$0xff] %vm190_vm2, %v515_v40  ;;  %v1665_v40 = vrot.slane %v4745_v5, %v1664_v34 }
 0x905   :  { %v851_v42 = vpop.permute.xlu0 %850  ;;  %4227 = vmatprep.subr.bf16.mxu0 %v4226_v46 }
 0x906   :  { %857 = vst.msk [vmem:[#allocation2] sm:$0xff] %vm856_vm3, %v851_v42  ;;  %4229 = vmatpush3.bf16.msra.mxu0 %v4226_v46  ;;  %v91_v46 = vld [vmem:[%s5138_s7] sm:$0xff] }
 0x907   :  { %4231 = vmatprep.subr.bf16.mxu0 %v4230_v49  ;;  %v4242_v48 = vpack.c.bf16 %v92_v47, %v91_v46  ;;  %v3779_v46 = vld [vmem:[%s5133_s2 + $0x30] sm:$0xff]  ;;  %v3780_v47 = vld [vmem:[%s5133_s2 + $0x38] sm:$0xff] }
 0x909   :  { %v853_v43 = vpop.permute.xlu1 %852 }
 0x90a   :  { %858 = vst.msk [vmem:[#allocation2 + $0x8] sm:$0xff] %vm856_vm3, %v853_v43  ;;  %4233 = vmatpush3.bf16.msra.mxu0 %v4230_v49  ;;  %v93_v49 = vld [vmem:[%s5138_s7 + $0x10] sm:$0xff] }
 0x90b   :  { %4243 = vmatprep.subr.bf16.mxu0 %v4242_v48 }
 0x90d   :  { %v1192_v44 = vpop.permute.xlu1 %1191 }
 0x90e   :  { %1198 = vst.msk [vmem:[#allocation2] sm:$0xff] %vm1197_vm4, %v1192_v44 }
 0x911   :  { %v1194_v45 = vpop.permute.xlu1 %1193 }
 0x912   :  { %1199 = vst.msk [vmem:[#allocation2 + $0x8] sm:$0xff] %vm1197_vm4, %v1194_v45 }
 0x933   :  { %v1446_v51 = vpop.f32.mrb[12].mxu0 }
 0x934   :  { %v1528_v52 = vmul.f32 %v4349_v50, %v1446_v51  ;;  %v4039_v53 = vpop.f32.mrb[13].mxu0  ;;  %v94_v50 = vld [vmem:[%s5138_s7 + $0x18] sm:$0xff] }
 0x935   :  { %v4246_v51 = vpack.c.bf16 %v94_v50, %v93_v49  ;;  %v96_v53 = vld [vmem:[%s5138_s7 + $0x28] sm:$0xff] }
 0x936   :  { %1532 = vrot.lane.b32.xlu0 %v1528_v52, %s4447_s1  ;;  %v95_v52 = vld [vmem:[%s5138_s7 + $0x20] sm:$0xff] }
 0x937   :  { %v1522_v55 = vpop.f32.mrb[18].mxu1 }
 0x938   :  { %v1529_v56 = vmul.f32 %v4351_v54, %v1522_v55  ;;  %v4044_v57 = vpop.f32.mrb[19].mxu1  ;;  %v4250_v54 = vpack.c.bf16 %v96_v53, %v95_v52  ;;  %v97_v55 = vld [vmem:[%s5138_s7 + $0x30] sm:$0xff] }
 0x93a   :  { %1534 = vrot.lane.b32.xlu1 %v1529_v56, %s4447_s1  ;;  %v98_v56 = vld [vmem:[%s5138_s7 + $0x38] sm:$0xff] }
 0x93b   :  { %v4254_v57 = vpack.c.bf16 %v98_v56, %v97_v55  ;;  %v1889_v55 = vsub.s32 3, %v4739_v1  ;;  %v1895_v56 = vsub.s32 4, %v4739_v1 }
 0x9a8   :  { %v1533_v58 = vpop.permute.xlu0 %1532 }
 0x9a9   :  { %1539 = vst.msk [vmem:[#allocation2] sm:$0xff] %vm1538_vm5, %v1533_v58  ;;  %v3772_v58 = vld [vmem:[%s5137_s6] ss:$0 sm:$0xff] }
 0x9ac   :  { %v1535_v59 = vpop.permute.xlu1 %1534 }
 0x9ad   :  { %1540 = vst.msk [vmem:[#allocation2 + $0x8] sm:$0xff] %vm1538_vm5, %v1535_v59 }
 0x9b0   :  { %v1541_v60 = vld [vmem:[#allocation2] sm:$0xff] }
 0x9b1   :  { %4053 = vmatprep.mubr.msk.f32.mxu0 %vm37_vm0, %v1541_v60 }
 0x9b4   :  { %v1542_v62 = vld [vmem:[#allocation2 + $0x8] sm:$0xff] }
 0x9b5   :  { %4054 = vmatmul.mubr.msk.f32.vlgmr.msra.gmra.mrb[14].mxu0 %vm37_vm0, %v1542_v62 }
 0x9b6   :  { %4245 = vmatpush3.bf16.msra.mxu0 %v4242_v48  ;;  %v4262_v48 = vpack.c.bf16 %v3780_v47, %v3779_v46 }
 0x9b7   :  { %4247 = vmatprep.subr.bf16.mxu0 %v4246_v51 }
 0x9ba   :  { %4249 = vmatpush3.bf16.msra.mxu0 %v4246_v51 }
 0x9bb   :  { %4251 = vmatprep.subr.bf16.mxu0 %v4250_v54 }
 0x9be   :  { %4253 = vmatpush3.bf16.msra.mxu0 %v4250_v54 }
 0x9bf   :  { %4255 = vmatprep.subr.bf16.mxu0 %v4254_v57 }
 0x9c2   :  { %4257 = vmatpush3.bf16.msra.mxu0 %v4254_v57  ;;  %v1890_v57 = vrot.slane %v4745_v5, %v1889_v55 }
 0x9c3   :  { %4107 = vmatprep.subr.mxu0 %v4432_v36 }
 0xa88   :  { %v4055_v7 = vpop.f32.mrb[14].mxu0 }
 0xa89   :  { %v1625_v8 = vadd.f32 %v4055_v7, %v1546_v6  ;;  %v1619_v39 = vpop.f32.mrb[15].mxu0 }
 0xa8a   :  { %v1620_v9 = vadd.f32 %v1619_v39, %v1546_v6 }
 0xa8b   :  { %v1629_v10 = vadd.f32 %v1625_v8, %v4532_v35 }
 0xa8c   :  { %v1628_v41 = vadd.f32 %v1620_v9, %v4528_v33  ;;  %v86_v33 = vld [vmem:[%s5136_s5] sm:$0xff] }
 0xa8d   :  { %v1633_v11 = vsel %vm37_vm0, %v1629_v10, 0.0  ;;  %v4234_v23 = vpack.c.bf16 %v87_v22, %v86_v33 }
 0xa8e   :  { %1634 = vadd.xlane.f32.xlu1 %v1633_v11  ;;  %v1630_v12 = vsel %vm37_vm0, %v1628_v41, 0.0 }
 0xa8f   :  { %1631 = vadd.xlane.f32.xlu0 %v1630_v12  ;;  %4235 = vmatprep.subr.bf16.mxu1 %v4234_v23 }
 0xa90   :  { %4237 = vmatpush3.bf16.msra.mxu1 %v4234_v23 }
 0xa91   :  { %4239 = vmatprep.subr.bf16.mxu1 %v4238_v25 }
 0xa94   :  { %4241 = vmatpush3.bf16.msra.mxu1 %v4238_v25 }
 0xb1b   :  { %v1635_v13 = vpop.xlane.xlu1 %1634 }
 0xb1c   :  { %v1637_v14 = vmul.f32 0.03125, %v1635_v13  ;;  %v1632_v15 = vpop.xlane.xlu0 %1631 }
 0xb1d   :  { %v1636_v16 = vmul.f32 0.03125, %v1632_v15 }
 0xb1e   :  { %v1639_v17 = vsub.f32 %v1629_v10, %v1637_v14 }
 0xb1f   :  { %v1638_v18 = vsub.f32 %v1628_v41, %v1636_v16 }
 0xb20   :  { %v1641_v21 = vmul.f32 %v1639_v17, %v1639_v17 }
 0xb21   :  { %v1640_v19 = vmul.f32 %v1638_v18, %v1638_v18 }
 0xb22   :  { %v1645_v35 = vsel %vm37_vm0, %v1641_v21, 0.0 }
 0xb23   :  { %v1642_v20 = vsel %vm37_vm0, %v1640_v19, 0.0 }
 0xb24   :  { %1643 = vadd.xlane.f32.xlu0 %v1642_v20 }
 0xb28   :  { %1646 = vadd.xlane.f32.xlu0 %v1645_v35  ;;  %v1775_v35 = vsub.s32 5, %v4739_v1 }
 0xb2a   :  { %v1776_v33 = vrot.slane %v4745_v5, %v1775_v35 }
 0xbb1   :  { %v1644_v27 = vpop.xlane.xlu0 %1643 }
 0xbb2   :  { %v1648_v63 = vmul.f32 0.03125, %v1644_v27 }
 0xbb4   :  { %v1650_v29 = vadd.f32 1e-05, %v1648_v63 }
 0xbb5   :  { %v1647_v30 = vpop.xlane.xlu0 %1646 }
 0xbb6   :  { %4352 = vrsqrt.f32 %v1650_v29  ;;  %v1649_v26 = vmul.f32 0.03125, %v1647_v30 }
 0xbb8   :  { %v1651_v31 = vadd.f32 1e-05, %v1649_v26 }
 0xbba   :  { %4354 = vrsqrt.f32 %v1651_v31 }
 0xbc0   :  { %v4353_v37 = vpop.eup %4352 }
 0xbc1   :  { %v1654_v38 = vmul.f32 %v4353_v37, %v1638_v18 }
 0xbc3   :  { %v1660_v42 = vmul.f32 %v1659_v28, %v1654_v38 }
 0xbc4   :  { %v4355_v43 = vpop.eup %4354 }
 0xbc5   :  { %v1655_v44 = vmul.f32 %v4355_v43, %v1639_v17  ;;  %v1666_v45 = vadd.f32 %v1665_v40, %v1660_v42 }
 0xbc7   :  { %v1661_v2 = vmul.f32 %v1659_v28, %v1655_v44  ;;  %4064 = vmatprep.mubr.msk.f32.mxu1 %vm37_vm0, %v1666_v45 }
 0xbc9   :  { %v1667_v4 = vadd.f32 %v1665_v40, %v1661_v2  ;;  %v3778_v2 = vld [vmem:[%s5133_s2 + $0x28] sm:$0xff] }
 0xbcb   :  { %4065 = vmatmul.mubr.msk.f32.vlgmr.msra.gmra.mrb[20].mxu1 %vm37_vm0, %v1667_v4 }
 0xc9e   :  { %v4066_v59 = vpop.f32.mrb[20].mxu1 }
 0xc9f   :  { %v1752_v60 = vadd.f32 %v4066_v59, %v3772_v58  ;;  %v1746_v62 = vpop.f32.mrb[21].mxu1 }
 0xca0   :  { %v1747_v0 = vadd.f32 %v3772_v58, %v1746_v62 }
 0xca1   :  { %v1756_v6 = vmul.f32 %v1752_v60, %v1752_v60 }
 0xca2   :  { %v1755_v7 = vmul.f32 %v1747_v0, %v1747_v0 }
 0xca3   :  { %v1758_v8 = vmul.f32 %v1756_v6, %v1752_v60 }
 0xca4   :  { %v1757_v39 = vmul.f32 %v1755_v7, %v1747_v0 }
 0xca5   :  { %v1760_v9 = vmul.f32 0.044715, %v1758_v8 }
 0xca6   :  { %v1759_v10 = vmul.f32 0.044715, %v1757_v39 }
 0xca7   :  { %v1762_v41 = vadd.f32 %v1760_v9, %v1752_v60  ;;  %v3800_v9 = vld [vmem:[%s5134_s3 + $0x1] ss:$0 sm:$0xff] }
 0xca8   :  { %v1761_v11 = vadd.f32 %v1759_v10, %v1747_v0 }
 0xca9   :  { %v1764_v12 = vmul.f32 0.7978846, %v1762_v41 }
 0xcaa   :  { %v1763_v13 = vmul.f32 0.7978846, %v1761_v11 }
 0xcab   :  { %4356 = vtanh.f32 %v1764_v12 }
 0xcac   :  { %4358 = vtanh.f32 %v1763_v13 }
 0xcb5   :  { %v4357_v14 = vpop.eup %4356 }
 0xcb6   :  { %v4359_v15 = vpop.eup %4358  ;;  %v1768_v16 = vadd.f32 1.0, %v4357_v14 }
 0xcb7   :  { %v1767_v17 = vadd.f32 1.0, %v4359_v15 }
 0xcb8   :  { %v1770_v18 = vmul.f32 0.5, %v1768_v16 }
 0xcb9   :  { %v1769_v19 = vmul.f32 0.5, %v1767_v17 }
 0xcba   :  { %v1772_v21 = vmul.f32 %v1770_v18, %v1752_v60 }
 0xcbb   :  { %v1771_v20 = vmul.f32 %v1769_v19, %v1747_v0  ;;  %v1896_v0 = vrot.slane %v4745_v5, %v1895_v56 }
 0xcbd   :  { %4083 = vmatprep.mubr.msk.f32.mxu0 %vm1777_vm6, %v1771_v20 }
 0xcbe   :  { %4084 = vmatmul.mubr.msk.f32.vlgmr.msra.gmra.mrb[16].mxu0 %vm1777_vm6, %v1772_v21 }
 0xcbf   :  { %4109 = vmatprep.mubr.msk.f32.mxu0 %vm4433_vm1, %v4432_v36 }
 0xd91   :  { %v4085_v22 = vpop.f32.mrb[16].mxu0 }
 0xd92   :  { %v1856_v23 = vadd.f32 %v4085_v22, %v1776_v33  ;;  %v1850_v24 = vpop.f32.mrb[17].mxu0 }
 0xd93   :  { %v1851_v61 = vadd.f32 %v1850_v24, %v1776_v33 }
 0xd94   :  { %v1860_v25 = vadd.f32 %v1856_v23, %v1667_v4 }
 0xd95   :  { %v1859_v27 = vadd.f32 %v1851_v61, %v1666_v45  ;;  %v3777_v45 = vld [vmem:[%s5133_s2 + $0x20] sm:$0xff] }
 0xd96   :  { %v1864_v63 = vsel %vm37_vm0, %v1860_v25, 0.0  ;;  %v4258_v4 = vpack.c.bf16 %v3778_v2, %v3777_v45 }
 0xd97   :  { %1865 = vadd.xlane.f32.xlu1 %v1864_v63  ;;  %v1861_v29 = vsel %vm37_vm0, %v1859_v27, 0.0 }
 0xd98   :  { %1862 = vadd.xlane.f32.xlu0 %v1861_v29  ;;  %4259 = vmatprep.subr.bf16.mxu1 %v4258_v4 }
 0xd99   :  { %4261 = vmatpush3.bf16.msra.mxu1 %v4258_v4 }
 0xd9a   :  { %4263 = vmatprep.subr.bf16.mxu1 %v4262_v48 }
 0xd9d   :  { %4265 = vmatpush3.bf16.msra.mxu1 %v4262_v48 }
 0xd9e   :  { %4097 = vmatprep.subr.mxu1 %v4432_v36 }
 0xe24   :  { %v1866_v30 = vpop.xlane.xlu1 %1865 }
 0xe25   :  { %v1868_v26 = vmul.f32 0.03125, %v1866_v30  ;;  %v1863_v31 = vpop.xlane.xlu0 %1862 }
 0xe26   :  { %v1867_v28 = vmul.f32 0.03125, %v1863_v31 }
 0xe27   :  { %v1870_v37 = vsub.f32 %v1860_v25, %v1868_v26 }
 0xe28   :  { %v1869_v38 = vsub.f32 %v1859_v27, %v1867_v28 }
 0xe29   :  { %v1872_v40 = vmul.f32 %v1870_v37, %v1870_v37 }
 0xe2a   :  { %v1871_v42 = vmul.f32 %v1869_v38, %v1869_v38 }
 0xe2b   :  { %v1876_v43 = vsel %vm37_vm0, %v1872_v40, 0.0 }
 0xe2c   :  { %1877 = vadd.xlane.f32.xlu1 %v1876_v43  ;;  %v1873_v44 = vsel %vm37_vm0, %v1871_v42, 0.0 }
 0xe2d   :  { %1874 = vadd.xlane.f32.xlu0 %v1873_v44 }
 0xeb9   :  { %v1878_v49 = vpop.xlane.xlu1 %1877 }
 0xeba   :  { %v1880_v50 = vmul.f32 0.03125, %v1878_v49  ;;  %v1875_v51 = vpop.xlane.xlu0 %1874 }
 0xebb   :  { %v1879_v52 = vmul.f32 0.03125, %v1875_v51 }
 0xebc   :  { %v1882_v53 = vadd.f32 1e-05, %v1880_v50 }
 0xebd   :  { %v1881_v54 = vadd.f32 1e-05, %v1879_v52 }
 0xebe   :  { %4360 = vrsqrt.f32 %v1882_v53 }
 0xebf   :  { %4362 = vrsqrt.f32 %v1881_v54 }
 0xec8   :  { %v4361_v58 = vpop.eup %4360 }
 0xec9   :  { %v4363_v59 = vpop.eup %4362  ;;  %v1886_v60 = vmul.f32 %v4361_v58, %v1870_v37 }
 0xeca   :  { %v1885_v62 = vmul.f32 %v4363_v59, %v1869_v38 }
 0xecb   :  { %v1892_v6 = vmul.f32 %v1890_v57, %v1886_v60 }
 0xecc   :  { %v1891_v7 = vmul.f32 %v1890_v57, %v1885_v62 }
 0xecd   :  { %v4841_v39 = vadd.f32 %v1896_v0, %v1892_v6 }
 0xece   :  { %v4839_v8 = vadd.f32 %v1896_v0, %v1891_v7 }
 0xed0   :  { %4094 = vmatprep.mubr.msk.f32.mxu1 %vm37_vm0, %v4839_v8 }
 0xed1   :  { %4095 = vmatmul.mubr.msk.f32.vlgmr.msra.gmra.mrb[22].mxu1 %vm37_vm0, %v4841_v39 }
 0xed2   :  { %4099 = vmatprep.mubr.msk.f32.mxu1 %vm4433_vm1, %v4432_v36 }
 0xfa4   :  { %v4096_v5 = vpop.f32.mrb[22].mxu1 }
 0xfa5   :  { %v4852_v10 = vadd.f32 %v4096_v5, %v3800_v9  ;;  %v2007_v41 = vpop.f32.mrb[23].mxu1 }
 0xfa6   :  { %v4854_v11 = vadd.f32 %v3800_v9, %v2007_v41 }
 0xfa7   :  { %2094 = vrot.lane.b32.xlu1 %v4852_v10, %s4434_s25 }
 0xfa8   :  { %2017 = vrot.lane.b32.xlu0 %v4854_v11, %s4434_s25 }
0x1019   :  { %v2095_v13 = vpop.permute.xlu1 %2094 }
0x101a   :  { %v2018_v12 = vpop.permute.xlu0 %2017 }
0x101b   :  { %4098 = vmatpush3.xpose.msk.msra.mxu1 %vm190_vm2, %v2018_v12 }
0x101c   :  { %4102 = vmatprep.subr.mxu1 %v4432_v36 }
0x101e   :  { %4100 = vmatmul.mubr.msk.f32.vlgmr.msra.gmra.mrb[24].mxu1 %vm190_vm2, %v4854_v11 }
0x101f   :  { %4103 = vmatpush3.xpose.msk.msra.mxu1 %vm190_vm2, %v2095_v13  ;;  %4104 = vmatprep.mubr.msk.f32.mxu1 %vm4433_vm1, %v4432_v36 }
0x1020   :  { %4112 = vmatprep.subr.mxu1 %v4432_v36 }
0x1022   :  { %4105 = vmatmul.mubr.msk.f32.vlgmr.msra.gmra.mrb[26].mxu1 %vm190_vm2, %v4852_v10 }
0x1023   :  { %4114 = vmatprep.mubr.msk.f32.mxu1 %vm4433_vm1, %v4432_v36 }
0x10f1   :  { %v2089_v14 = vpop.f32.mrb[24].mxu1 }
0x10f2   :  { %v4101_v15 = vpop.f32.mrb[25].mxu1  ;;  %v2170_v16 = vsel %vm190_vm2, %v2089_v14, -inf }
0x10f3   :  { %2171 = vmax.xlane.f32.xlu1 %v2170_v16 }
0x10f5   :  { %v2166_v17 = vpop.f32.mrb[26].mxu1 }
0x10f6   :  { %v4106_v18 = vpop.f32.mrb[27].mxu1  ;;  %v2173_v19 = vsel %vm190_vm2, %v2166_v17, -inf }
0x10f7   :  { %2174 = vmax.xlane.f32.xlu0 %v2173_v19 }
0x1104   :  { %2264 = vrot.lane.b32.xlu1 %v4852_v10, %s4435_s26 }
0x1108   :  { %2348 = vrot.lane.b32.xlu1 %v4854_v11, %s4436_s27 }
0x110c   :  { %2426 = vrot.lane.b32.xlu1 %v4852_v10, %s4436_s27 }
0x110d   :  { %2188 = vrot.lane.b32.xlu0 %v4854_v11, %s4435_s26 }
0x1110   :  { %2424 = vrot.lane.b32.xlu1 %v4852_v10, %s4437_s28 }
0x1111   :  { %2346 = vrot.lane.b32.xlu0 %v4854_v11, %s4437_s28 }
0x1114   :  { %2596 = vrot.lane.b32.xlu1 %v4852_v10, %s4438_s29 }
0x1115   :  { %2520 = vrot.lane.b32.xlu0 %v4854_v11, %s4438_s29 }
0x1118   :  { %2766 = vrot.lane.b32.xlu1 %v4852_v10, %s4439_s30 }
0x1180   :  { %v2172_v20 = vpop.xlane.xlu1 %2171 }
0x1181   :  { %v2176_v21 = vsub.f32 %v2089_v14, %v2172_v20 }
0x1183   :  { %v2178_v33 = vmul.f32 1.442695, %v2176_v21 }
0x1184   :  { %v2265_v22 = vpop.permute.xlu1 %2264  ;;  %v2175_v23 = vpop.xlane.xlu0 %2174 }
0x1185   :  { %4364 = vpow2.f32 %v2178_v33  ;;  %v2177_v24 = vsub.f32 %v2166_v17, %v2175_v23  ;;  %4113 = vmatpush3.msra.mxu1 %v2265_v22 }
0x1186   :  { %4122 = vmatprep.subr.mxu1 %v4432_v36 }
0x1187   :  { %v2180_v61 = vmul.f32 1.442695, %v2177_v24 }
0x1188   :  { %v2349_v25 = vpop.permute.xlu1 %2348  ;;  %v2189_v27 = vpop.permute.xlu0 %2188 }
0x1189   :  { %4366 = vpow2.f32 %v2180_v61  ;;  %4108 = vmatpush3.msra.mxu0 %v2189_v27 }
0x118a   :  { %4117 = vmatprep.subr.mxu0 %v4432_v36 }
0x118c   :  { %v2427_v63 = vpop.permute.xlu1 %2426  ;;  %v2347_v29 = vpop.permute.xlu0 %2346 }
0x118f   :  { %v4894_v30 = vpop.eup %4364 }
0x1190   :  { %4110 = vmatmul.mubr.msk.f32.vlgmr.msra.gmra.mrb[18].mxu0 %vm190_vm2, %v4894_v30  ;;  %v2425_v26 = vpop.permute.xlu1 %2424  ;;  %v2521_v28 = vpop.permute.xlu0 %2520 }
0x1191   :  { %4118 = vmatpush3.xpose.msk.msra.mxu0 %vm190_vm2, %v2349_v25  ;;  %4119 = vmatprep.mubr.msk.f32.mxu0 %vm4433_vm1, %v4432_v36 }
0x1192   :  { %4127 = vmatprep.subr.mxu0 %v4432_v36 }
0x1193   :  { %v4902_v31 = vpop.eup %4366 }
0x1194   :  { %4115 = vmatmul.mubr.msk.f32.vlgmr.msra.gmra.mrb[28].mxu1 %vm190_vm2, %v4902_v31  ;;  %4120 = vmatmul.mubr.msk.f32.vlgmr.msra.gmra.mrb[20].mxu0 %vm190_vm2, %v2347_v29  ;;  %v2597_v37 = vpop.permute.xlu1 %2596 }
0x1195   :  { %4123 = vmatpush3.xpose.msk.msra.mxu1 %vm190_vm2, %v2427_v63  ;;  %4128 = vmatpush3.msra.mxu0 %v2521_v28 }
0x1196   :  { %4124 = vmatprep.mubr.msk.f32.mxu1 %vm4433_vm1, %v4432_v36  ;;  %4132 = vmatprep.subr.mxu1 %v4432_v36 }
0x1197   :  { %4129 = vmatprep.mubr.msk.f32.mxu0 %vm4433_vm1, %v4432_v36  ;;  %4137 = vmatprep.subr.mxu0 %v4432_v36 }
0x1198   :  { %4125 = vmatmul.mubr.msk.f32.vlgmr.msra.gmra.mrb[30].mxu1 %vm190_vm2, %v2425_v26  ;;  %v2767_v48 = vpop.permute.xlu1 %2766 }
0x1199   :  { %4133 = vmatpush3.msra.mxu1 %v2597_v37  ;;  %4134 = vmatprep.mubr.msk.f32.mxu1 %vm4433_vm1, %v4432_v36 }
0x119a   :  { %4142 = vmatprep.subr.mxu1 %v4432_v36 }
0x1263   :  { %v4918_v38 = vpop.f32.mrb[18].mxu0 }
0x1264   :  { %v4111_v40 = vpop.f32.mrb[19].mxu0 }
0x1267   :  { %v4920_v42 = vpop.f32.mrb[28].mxu1  ;;  %v2420_v43 = vpop.f32.mrb[20].mxu0 }
0x1268   :  { %v4116_v44 = vpop.f32.mrb[29].mxu1  ;;  %v4121_v45 = vpop.f32.mrb[21].mxu0  ;;  %v2502_v2 = vsel %vm190_vm2, %v2420_v43, -inf }
0x1269   :  { %2503 = vmax.xlane.f32.xlu0 %v2502_v2 }
0x126b   :  { %v2498_v4 = vpop.f32.mrb[30].mxu1 }
0x126c   :  { %v4126_v46 = vpop.f32.mrb[31].mxu1  ;;  %v2505_v47 = vsel %vm190_vm2, %v2498_v4, -inf }
0x126d   :  { %2506 = vmax.xlane.f32.xlu1 %v2505_v47 }
0x127e   :  { %2764 = vrot.lane.b32.xlu1 %v4852_v10, %s4440_s10 }
0x127f   :  { %2688 = vrot.lane.b32.xlu0 %v4854_v11, %s4439_s30 }
0x1282   :  { %2936 = vrot.lane.b32.xlu1 %v4852_v10, %s4441_s11 }
0x1283   :  { %2686 = vrot.lane.b32.xlu0 %v4854_v11, %s4440_s10 }
0x1286   :  { %3106 = vrot.lane.b32.xlu1 %v4852_v10, %s4442_s12 }
0x1287   :  { %2860 = vrot.lane.b32.xlu0 %v4854_v11, %s4441_s11 }
0x12f6   :  { %v2504_v49 = vpop.xlane.xlu0 %2503 }
0x12f7   :  { %v2508_v50 = vsub.f32 %v2420_v43, %v2504_v49 }
0x12f9   :  { %v2510_v51 = vmul.f32 1.442695, %v2508_v50 }
0x12fa   :  { %v2507_v52 = vpop.xlane.xlu1 %2506  ;;  %v2689_v57 = vpop.permute.xlu0 %2688 }
0x12fb   :  { %4368 = vpow2.f32 %v2510_v51  ;;  %v2509_v53 = vsub.f32 %v2498_v4, %v2507_v52 }
0x12fd   :  { %v2512_v54 = vmul.f32 1.442695, %v2509_v53 }
0x12fe   :  { %v2687_v58 = vpop.permute.xlu0 %2686  ;;  %v2765_v60 = vpop.permute.xlu1 %2764 }
0x12ff   :  { %4370 = vpow2.f32 %v2512_v54 }
0x1302   :  { %v2861_v0 = vpop.permute.xlu0 %2860  ;;  %v2937_v6 = vpop.permute.xlu1 %2936 }
0x1305   :  { %v4936_v59 = vpop.eup %4368 }
0x1306   :  { %4130 = vmatmul.mubr.msk.f32.vlgmr.msra.gmra.mrb[22].mxu0 %vm190_vm2, %v4936_v59  ;;  %v3107_v18 = vpop.permute.xlu1 %3106 }
0x1307   :  { %4138 = vmatpush3.xpose.msk.msra.mxu0 %vm190_vm2, %v2689_v57  ;;  %4139 = vmatprep.mubr.msk.f32.mxu0 %vm4433_vm1, %v4432_v36 }
0x1308   :  { %4147 = vmatprep.subr.mxu0 %v4432_v36 }
0x1309   :  { %v4944_v62 = vpop.eup %4370 }
0x130a   :  { %4135 = vmatmul.mubr.msk.f32.vlgmr.msra.gmra.mrb[32].mxu1 %vm190_vm2, %v4944_v62  ;;  %4140 = vmatmul.mubr.msk.f32.vlgmr.msra.gmra.mrb[24].mxu0 %vm190_vm2, %v2687_v58  ;;  %v2517_v47 = vsel %vm190_vm2, %v4944_v62, 0.0 }
0x130b   :  { %4143 = vmatpush3.xpose.msk.msra.mxu1 %vm190_vm2, %v2767_v48  ;;  %4148 = vmatpush3.msra.mxu0 %v2861_v0  ;;  %v2185_v0 = vsel %vm190_vm2, %v4902_v31, 0.0 }
0x130c   :  { %4144 = vmatprep.mubr.msk.f32.mxu1 %vm4433_vm1, %v4432_v36  ;;  %4152 = vmatprep.subr.mxu1 %v4432_v36 }
0x130d   :  { %4149 = vmatprep.mubr.msk.f32.mxu0 %vm4433_vm1, %v4432_v36  ;;  %4157 = vmatprep.subr.mxu0 %v4432_v36 }
0x130e   :  { %4145 = vmatmul.mubr.msk.f32.vlgmr.msra.gmra.mrb[34].mxu1 %vm190_vm2, %v2765_v60  ;;  %v2182_v60 = vsel %vm190_vm2, %v4894_v30, 0.0 }
0x130f   :  { %4153 = vmatpush3.msra.mxu1 %v2937_v6  ;;  %4154 = vmatprep.mubr.msk.f32.mxu1 %vm4433_vm1, %v4432_v36 }
0x1310   :  { %4162 = vmatprep.subr.mxu1 %v4432_v36 }
0x13d9   :  { %v4960_v7 = vpop.f32.mrb[22].mxu0 }
0x13da   :  { %v4131_v9 = vpop.f32.mrb[23].mxu0 }
0x13dd   :  { %v4962_v5 = vpop.f32.mrb[32].mxu1  ;;  %v2760_v41 = vpop.f32.mrb[24].mxu0 }
0x13de   :  { %v4136_v12 = vpop.f32.mrb[33].mxu1  ;;  %v4141_v13 = vpop.f32.mrb[25].mxu0  ;;  %v2842_v14 = vsel %vm190_vm2, %v2760_v41, -inf }
0x13df   :  { %2843 = vmax.xlane.f32.xlu0 %v2842_v14 }
0x13e1   :  { %v2838_v15 = vpop.f32.mrb[34].mxu1 }
0x13e2   :  { %v4146_v16 = vpop.f32.mrb[35].mxu1  ;;  %v2845_v17 = vsel %vm190_vm2, %v2838_v15, -inf }
0x13e3   :  { %2846 = vmax.xlane.f32.xlu1 %v2845_v17 }
0x13f4   :  { %3104 = vrot.lane.b32.xlu1 %v4852_v10, %s4443_s0 }
0x13f5   :  { %3028 = vrot.lane.b32.xlu0 %v4854_v11, %s4442_s12 }
0x13f9   :  { %3026 = vrot.lane.b32.xlu0 %v4854_v11, %s4443_s0 }
0x146c   :  { %v2844_v19 = vpop.xlane.xlu0 %2843 }
0x146d   :  { %v2848_v20 = vsub.f32 %v2760_v41, %v2844_v19 }
0x146f   :  { %v2850_v21 = vmul.f32 1.442695, %v2848_v20 }
0x1470   :  { %v2847_v33 = vpop.xlane.xlu1 %2846  ;;  %v3029_v24 = vpop.permute.xlu0 %3028 }
0x1471   :  { %4372 = vpow2.f32 %v2850_v21  ;;  %v2849_v22 = vsub.f32 %v2838_v15, %v2847_v33 }
0x1473   :  { %v2852_v23 = vmul.f32 1.442695, %v2849_v22 }
0x1474   :  { %v3027_v27 = vpop.permute.xlu0 %3026  ;;  %v3105_v63 = vpop.permute.xlu1 %3104 }
0x1475   :  { %4374 = vpow2.f32 %v2852_v23 }
0x147b   :  { %v4373_v61 = vpop.eup %4372 }
0x147c   :  { %4150 = vmatmul.mubr.msk.f32.vlgmr.msra.gmra.mrb[26].mxu0 %vm190_vm2, %v4373_v61  ;;  %v2854_v46 = vsel %vm190_vm2, %v4373_v61, 0.0 }
0x147d   :  { %4158 = vmatpush3.xpose.msk.msra.mxu0 %vm190_vm2, %v3029_v24  ;;  %4159 = vmatprep.mubr.msk.f32.mxu0 %vm4433_vm1, %v4432_v36 }
0x147e   :  { %4167 = vmatprep.subr.mxu0 %v4432_v36 }
0x147f   :  { %v4375_v25 = vpop.eup %4374 }
0x1480   :  { %4155 = vmatmul.mubr.msk.f32.vlgmr.msra.gmra.mrb[36].mxu1 %vm190_vm2, %v4375_v25  ;;  %4160 = vmatmul.mubr.msk.f32.vlgmr.msra.gmra.mrb[28].mxu0 %vm190_vm2, %v3027_v27  ;;  %v2857_v48 = vsel %vm190_vm2, %v4375_v25, 0.0 }
0x1481   :  { %4163 = vmatpush3.xpose.msk.msra.mxu1 %vm190_vm2, %v3107_v18  ;;  %4164 = vmatprep.mubr.msk.f32.mxu1 %vm4433_vm1, %v4432_v36 }
0x1482   :  { %4172 = vmatprep.subr.mxu1 %v4432_v36  ;;  %4169 = vmatprep.mubr.msk.f32.mxu0 %vm4433_vm1, %v4432_v36 }
0x1484   :  { %4165 = vmatmul.mubr.msk.f32.vlgmr.msra.gmra.mrb[38].mxu1 %vm190_vm2, %v3105_v63 }
0x1485   :  { %4174 = vmatprep.mubr.msk.f32.mxu1 %vm4433_vm1, %v4432_v36  ;;  %v2514_v36 = vsel %vm190_vm2, %v4936_v59, 0.0 }
0x154f   :  { %v2932_v29 = vpop.f32.mrb[26].mxu0 }
0x1550   :  { %v4151_v26 = vpop.f32.mrb[27].mxu0 }
0x1551   :  { %v3785_v26 = vld [vmem:[%s5135_s4 + $0x38] sm:$0xff] }
0x1553   :  { %v3008_v28 = vpop.f32.mrb[36].mxu1  ;;  %v3100_v37 = vpop.f32.mrb[28].mxu0 }
0x1554   :  { %v4156_v40 = vpop.f32.mrb[37].mxu1  ;;  %v4161_v43 = vpop.f32.mrb[29].mxu0  ;;  %v3182_v44 = vsel %vm190_vm2, %v3100_v37, -inf }
0x1555   :  { %3183 = vmax.xlane.f32.xlu0 %v3182_v44 }
0x1557   :  { %v3178_v45 = vpop.f32.mrb[38].mxu1 }
0x1558   :  { %v4166_v2 = vpop.f32.mrb[39].mxu1  ;;  %v3185_v4 = vsel %vm190_vm2, %v3178_v45, -inf }
0x1559   :  { %3186 = vmax.xlane.f32.xlu1 %v3185_v4 }
0x156a   :  { %3276 = vrot.lane.b32.xlu1 %v4852_v10, %s4444_s13 }
0x156b   :  { %3200 = vrot.lane.b32.xlu0 %v4854_v11, %s4444_s13 }
0x158a   :  { %2515 = vadd.xlane.f32.xlu0 %v2514_v36 }
0x158e   :  { %2855 = vadd.xlane.f32.xlu0 %v2854_v46  ;;  %2518 = vadd.xlane.f32.xlu1 %v2517_v47 }
0x1592   :  { %2858 = vadd.xlane.f32.xlu0 %v2857_v48 }
0x15e2   :  { %v3184_v49 = vpop.xlane.xlu0 %3183 }
0x15e3   :  { %v3188_v50 = vsub.f32 %v3100_v37, %v3184_v49 }
0x15e5   :  { %v3190_v10 = vmul.f32 1.442695, %v3188_v50  ;;  %v5043_v50 = vld [vmem:[%s5139_s8 + $0x8] sm:$0x3f] }
0x15e6   :  { %v3201_v51 = vpop.permute.xlu0 %3200  ;;  %v3187_v52 = vpop.xlane.xlu1 %3186 }
0x15e7   :  { %4376 = vpow2.f32 %v3190_v10  ;;  %v3189_v11 = vsub.f32 %v3178_v45, %v3187_v52  ;;  %4168 = vmatpush3.msra.mxu0 %v3201_v51  ;;  %v3371_v10 = vrot.slane %v5043_v50, %v1545_v3 }
0x15e9   :  { %v3192_v53 = vmul.f32 1.442695, %v3189_v11 }
0x15ea   :  { %v3277_v54 = vpop.permute.xlu1 %3276 }
0x15eb   :  { %4378 = vpow2.f32 %v3192_v53  ;;  %4173 = vmatpush3.msra.mxu1 %v3277_v54 }
0x15f1   :  { %v4377_v57 = vpop.eup %4376 }
0x15f2   :  { %4170 = vmatmul.mubr.msk.f32.vlgmr.msra.gmra.mrb[30].mxu0 %vm190_vm2, %v4377_v57  ;;  %v3194_v58 = vsel %vm190_vm2, %v4377_v57, 0.0 }
0x15f3   :  { %3195 = vadd.xlane.f32.xlu0 %v3194_v58 }
0x15f5   :  { %v4379_v59 = vpop.eup %4378 }
0x15f6   :  { %4175 = vmatmul.mubr.msk.f32.vlgmr.msra.gmra.mrb[40].mxu1 %vm190_vm2, %v4379_v59  ;;  %v3197_v62 = vsel %vm190_vm2, %v4379_v59, 0.0 }
0x15f7   :  { %2183 = vadd.xlane.f32.xlu0 %v2182_v60  ;;  %3198 = vadd.xlane.f32.xlu1 %v3197_v62 }
0x15fb   :  { %2186 = vadd.xlane.f32.xlu1 %v2185_v0 }
0x1617   :  { %v2516_v6 = vpop.xlane.xlu0 %2515 }
0x1618   :  { %4380 = vrcp.f32 %v2516_v6 }
0x161b   :  { %v2856_v9 = vpop.xlane.xlu0 %2855  ;;  %v2519_v41 = vpop.xlane.xlu1 %2518 }
0x161c   :  { %4382 = vrcp.f32 %v2519_v41 }
0x161d   :  { %4384 = vrcp.f32 %v2856_v9 }
0x161f   :  { %v2859_v12 = vpop.xlane.xlu0 %2858 }
0x1620   :  { %4386 = vrcp.f32 %v2859_v12 }
0x1622   :  { %v4381_v13 = vpop.eup %4380 }
0x1623   :  { %v2674_v14 = vmul.f32 %v4381_v13, %v4960_v7 }
0x1625   :  { %2678 = vrot.lane.b32.xlu0 %v2674_v14, %s4445_s14  ;;  %v3787_v14 = vld [vmem:[%s5136_s5 + $0x28] sm:$0xff] }
0x1626   :  { %v4383_v30 = vpop.eup %4382 }
0x1627   :  { %v2675_v15 = vmul.f32 %v4383_v30, %v4962_v5  ;;  %v4385_v16 = vpop.eup %4384 }
0x1628   :  { %v3014_v31 = vmul.f32 %v4385_v16, %v2932_v29  ;;  %v3784_v29 = vld [vmem:[%s5135_s4 + $0x30] sm:$0xff]  ;;  %v3789_v16 = vld [vmem:[%s5136_s5 + $0x38] sm:$0xff] }
0x1629   :  { %2680 = vrot.lane.b32.xlu1 %v2675_v15, %s4445_s14  ;;  %v3788_v15 = vld [vmem:[%s5136_s5 + $0x30] sm:$0xff] }
0x162a   :  { %v4387_v17 = vpop.eup %4386 }
0x162b   :  { %v3015_v18 = vmul.f32 %v4387_v17, %v3008_v28  ;;  %v4270_v28 = vpack.c.bf16 %v3785_v26, %v3784_v29  ;;  %v3794_v26 = vld [vmem:[%s5138_s7 + $0x58] sm:$0xff] }
0x162d   :  { %3018 = vrot.lane.b32.xlu1 %v3014_v31, %s4446_s15  ;;  %v4278_v31 = vpack.c.bf16 %v3789_v16, %v3788_v15 }
0x1631   :  { %3020 = vrot.lane.b32.xlu1 %v3015_v18, %s4446_s15 }
0x1680   :  { %v3196_v19 = vpop.xlane.xlu0 %3195 }
0x1684   :  { %v2184_v20 = vpop.xlane.xlu0 %2183  ;;  %v3199_v21 = vpop.xlane.xlu1 %3198 }
0x1685   :  { %4388 = vrcp.f32 %v2184_v20 }
0x1688   :  { %v2187_v7 = vpop.xlane.xlu1 %2186 }
0x1689   :  { %4390 = vrcp.f32 %v2187_v7 }
0x168a   :  { %4392 = vrcp.f32 %v3196_v19 }
0x168b   :  { %4394 = vrcp.f32 %v3199_v21 }
0x168f   :  { %v4389_v33 = vpop.eup %4388 }
0x1690   :  { %v2342_v22 = vmul.f32 %v4389_v33, %v4918_v38  ;;  %v3782_v38 = vld [vmem:[%s5135_s4 + $0x20] sm:$0xff]  ;;  %v3484_v33 = vrot.slane %v5043_v50, %v1658_v32 }
0x1691   :  { %v3791_v32 = vld [vmem:[%s5138_s7 + $0x40] sm:$0xff] }
0x1692   :  { %2344 = vst.msk [vmem:[#allocation2] sm:$0xff] %vm190_vm2, %v2342_v22 }
0x1693   :  { %v4391_v5 = vpop.eup %4390 }
0x1694   :  { %v2343_v23 = vmul.f32 %v4391_v5, %v4920_v42  ;;  %v3783_v42 = vld [vmem:[%s5135_s4 + $0x28] sm:$0xff]  ;;  %v4393_v37 = vpop.eup %4392 }
0x1695   :  { %v4266_v63 = vpack.c.bf16 %v3783_v42, %v3782_v38  ;;  %v4395_v45 = vpop.eup %4394 }
0x1696   :  { %2345 = vst.msk [vmem:[#allocation2 + $0x8] sm:$0xff] %vm190_vm2, %v2343_v23  ;;  %v3490_v23 = vrot.slane %v5043_v50, %v1664_v34  ;;  %v3793_v34 = vld [vmem:[%s5138_s7 + $0x50] sm:$0xff] }
0x1697   :  { %v2679_v24 = vpop.permute.xlu0 %2678  ;;  %4267 = vmatprep.subr.bf16.mxu0 %v4266_v63 }
0x1698   :  { %2684 = vst.msk [vmem:[#allocation2] sm:$0xff] %vm856_vm3, %v2679_v24  ;;  %4269 = vmatpush3.bf16.msra.mxu0 %v4266_v63  ;;  %v3792_v63 = vld [vmem:[%s5138_s7 + $0x48] sm:$0xff] }
0x1699   :  { %4271 = vmatprep.subr.bf16.mxu0 %v4270_v28  ;;  %v4282_v29 = vpack.c.bf16 %v3792_v63, %v3791_v32  ;;  %v3714_v32 = vrot.slane %v5043_v50, %v1889_v55 }
0x169b   :  { %v2681_v61 = vpop.permute.xlu1 %2680 }
0x169c   :  { %2685 = vst.msk [vmem:[#allocation2 + $0x8] sm:$0xff] %vm856_vm3, %v2681_v61  ;;  %4273 = vmatpush3.bf16.msra.mxu0 %v4270_v28  ;;  %v4286_v28 = vpack.c.bf16 %v3794_v26, %v3793_v34  ;;  %v3720_v26 = vrot.slane %v5043_v50, %v1895_v56 }
0x169d   :  { %4283 = vmatprep.subr.bf16.mxu0 %v4282_v29 }
0x169f   :  { %v3019_v25 = vpop.permute.xlu1 %3018 }
0x16a0   :  { %3024 = vst.msk [vmem:[#allocation2] sm:$0xff] %vm1197_vm4, %v3019_v25 }
0x16a3   :  { %v3021_v27 = vpop.permute.xlu1 %3020 }
0x16a4   :  { %3025 = vst.msk [vmem:[#allocation2 + $0x8] sm:$0xff] %vm1197_vm4, %v3021_v27 }
0x16c5   :  { %v3272_v40 = vpop.f32.mrb[30].mxu0 }
0x16c6   :  { %v3354_v43 = vmul.f32 %v4393_v37, %v3272_v40  ;;  %v4171_v44 = vpop.f32.mrb[31].mxu0  ;;  %v3795_v37 = vld [vmem:[%s5138_s7 + $0x60] sm:$0xff]  ;;  %v3796_v40 = vld [vmem:[%s5138_s7 + $0x68] sm:$0xff] }
0x16c7   :  { %v3797_v44 = vld [vmem:[%s5138_s7 + $0x70] sm:$0xff] }
0x16c8   :  { %3358 = vrot.lane.b32.xlu0 %v3354_v43, %s4447_s1  ;;  %v4290_v43 = vpack.c.bf16 %v3796_v40, %v3795_v37 }
0x16c9   :  { %v3348_v2 = vpop.f32.mrb[40].mxu1 }
0x16ca   :  { %v3355_v4 = vmul.f32 %v4395_v45, %v3348_v2  ;;  %v4176_v36 = vpop.f32.mrb[41].mxu1  ;;  %v3798_v45 = vld [vmem:[%s5138_s7 + $0x78] sm:$0xff] }
0x16cb   :  { %v4294_v2 = vpack.c.bf16 %v3798_v45, %v3797_v44 }
0x16cc   :  { %3360 = vrot.lane.b32.xlu1 %v3355_v4, %s4447_s1  ;;  %v3829_v4 = vld [vmem:[%s5137_s6 + $0x1] ss:$0 sm:$0xff]  ;;  %s4448_s6 = smov [#allocation3]  }
0x16cd   :  { %s3730_s7 = sshll.u32 %s4448_s6, 4  ;;  %s3731_s7 = int_to_ptr.vmem [resolvable:$true] %s3730_s7 }
0x16ce   :  { %s4408_s11 = scalar_lea.vmem %s3731_s7, 256  ;;  %p4413_p1 = scmp.lt.s32.totalorder %s3731_s7, %s3731_s7 }
0x16cf   :  { %p4409_p0 = scmp.ne.s32.totalorder %s3731_s7, %s4408_s11  ;;  %p4414_p2 = scmp.lt.s32.totalorder %s4408_s11, %s4408_s11 }
0x16d1   :  { %p4415_p3 = por %p4414_p2, %p4413_p1 }
0x16d3   :  { %p4416_p4 = pnand %p4415_p3, %p4409_p0 }
0x173a   :  { %v3359_v46 = vpop.permute.xlu0 %3358 }
0x173b   :  { %3364 = vst.msk [vmem:[#allocation2] sm:$0xff] %vm1538_vm5, %v3359_v46 }
0x173e   :  { %v3361_v47 = vpop.permute.xlu1 %3360 }
0x173f   :  { %3365 = vst.msk [vmem:[#allocation2 + $0x8] sm:$0xff] %vm1538_vm5, %v3361_v47 }
0x1742   :  { %v3366_v48 = vld [vmem:[#allocation2] sm:$0xff] }
0x1743   :  { %4185 = vmatprep.mubr.msk.f32.mxu0 %vm37_vm0, %v3366_v48 }
0x1746   :  { %v3367_v49 = vld [vmem:[#allocation2 + $0x8] sm:$0xff] }
0x1747   :  { %4186 = vmatmul.mubr.msk.f32.vlgmr.msra.gmra.mrb[32].mxu0 %vm37_vm0, %v3367_v49 }
0x1748   :  { %4285 = vmatpush3.bf16.msra.mxu0 %v4282_v29 }
0x1749   :  { %4287 = vmatprep.subr.bf16.mxu0 %v4286_v28 }
0x174c   :  { %4289 = vmatpush3.bf16.msra.mxu0 %v4286_v28 }
0x174d   :  { %4291 = vmatprep.subr.bf16.mxu0 %v4290_v43 }
0x1750   :  { %4293 = vmatpush3.bf16.msra.mxu0 %v4290_v43 }
0x1751   :  { %4295 = vmatprep.subr.bf16.mxu0 %v4294_v2 }
0x1754   :  { %4297 = vmatpush3.bf16.msra.mxu0 %v4294_v2 }
0x181a   :  { %v4187_v51 = vpop.f32.mrb[32].mxu0 }
0x181b   :  { %v3450_v52 = vadd.f32 %v4187_v51, %v3371_v10  ;;  %v3444_v11 = vpop.f32.mrb[33].mxu0 }
0x181c   :  { %v3445_v53 = vadd.f32 %v3444_v11, %v3371_v10 }
0x181d   :  { %v3454_v54 = vadd.f32 %v3450_v52, %v4841_v39 }
0x181e   :  { %v3453_v57 = vadd.f32 %v3445_v53, %v4839_v8  ;;  %v3786_v8 = vld [vmem:[%s5136_s5 + $0x20] sm:$0xff] }
0x181f   :  { %v3458_v58 = vsel %vm37_vm0, %v3454_v54, 0.0  ;;  %v4274_v30 = vpack.c.bf16 %v3787_v14, %v3786_v8 }
0x1820   :  { %3459 = vadd.xlane.f32.xlu1 %v3458_v58  ;;  %v3455_v59 = vsel %vm37_vm0, %v3453_v57, 0.0 }
0x1821   :  { %3456 = vadd.xlane.f32.xlu0 %v3455_v59  ;;  %4275 = vmatprep.subr.bf16.mxu1 %v4274_v30 }
0x1822   :  { %4277 = vmatpush3.bf16.msra.mxu1 %v4274_v30 }
0x1823   :  { %4279 = vmatprep.subr.bf16.mxu1 %v4278_v31 }
0x1826   :  { %4281 = vmatpush3.bf16.msra.mxu1 %v4278_v31 }
0x18ad   :  { %v3460_v60 = vpop.xlane.xlu1 %3459 }
0x18ae   :  { %v3462_v62 = vmul.f32 0.03125, %v3460_v60  ;;  %v3457_v0 = vpop.xlane.xlu0 %3456 }
0x18af   :  { %v3461_v6 = vmul.f32 0.03125, %v3457_v0 }
0x18b0   :  { %v3464_v9 = vsub.f32 %v3454_v54, %v3462_v62 }
0x18b1   :  { %v3463_v3 = vsub.f32 %v3453_v57, %v3461_v6 }
0x18b2   :  { %v3466_v13 = vmul.f32 %v3464_v9, %v3464_v9 }
0x18b3   :  { %v3465_v41 = vmul.f32 %v3463_v3, %v3463_v3 }
0x18b4   :  { %v3470_v39 = vsel %vm37_vm0, %v3466_v13, 0.0  ;;  %v3601_v13 = vrot.slane %v5043_v50, %v1775_v35 }
0x18b5   :  { %v3467_v12 = vsel %vm37_vm0, %v3465_v41, 0.0 }
0x18b6   :  { %3468 = vadd.xlane.f32.xlu0 %v3467_v12 }
0x18ba   :  { %3471 = vadd.xlane.f32.xlu0 %v3470_v39 }
0x1943   :  { %v3469_v17 = vpop.xlane.xlu0 %3468 }
0x1944   :  { %v3473_v18 = vmul.f32 0.03125, %v3469_v17 }
0x1946   :  { %v3475_v19 = vadd.f32 1e-05, %v3473_v18 }
0x1947   :  { %v3472_v20 = vpop.xlane.xlu0 %3471 }
0x1948   :  { %4396 = vrsqrt.f32 %v3475_v19  ;;  %v3474_v21 = vmul.f32 0.03125, %v3472_v20 }
0x194a   :  { %v3476_v7 = vadd.f32 1e-05, %v3474_v21 }
0x194c   :  { %4398 = vrsqrt.f32 %v3476_v7 }
0x1952   :  { %v4397_v22 = vpop.eup %4396 }
0x1953   :  { %v3479_v5 = vmul.f32 %v4397_v22, %v3463_v3 }
0x1955   :  { %v3485_v24 = vmul.f32 %v3484_v33, %v3479_v5 }
0x1956   :  { %v4399_v61 = vpop.eup %4398 }
0x1957   :  { %v3480_v25 = vmul.f32 %v4399_v61, %v3464_v9  ;;  %v3491_v27 = vadd.f32 %v3490_v23, %v3485_v24 }
0x1959   :  { %v3486_v38 = vmul.f32 %v3484_v33, %v3480_v25  ;;  %4196 = vmatprep.mubr.msk.f32.mxu1 %vm37_vm0, %v3491_v27 }
0x195b   :  { %v3492_v42 = vadd.f32 %v3490_v23, %v3486_v38 }
0x195d   :  { %4197 = vmatmul.mubr.msk.f32.vlgmr.msra.gmra.mrb[42].mxu1 %vm37_vm0, %v3492_v42 }
0x1a30   :  { %v4198_v36 = vpop.f32.mrb[42].mxu1 }
0x1a31   :  { %v3577_v46 = vadd.f32 %v4198_v36, %v3829_v4  ;;  %v3571_v47 = vpop.f32.mrb[43].mxu1 }
0x1a32   :  { %v3572_v48 = vadd.f32 %v3829_v4, %v3571_v47 }
0x1a33   :  { %v3581_v49 = vmul.f32 %v3577_v46, %v3577_v46 }
0x1a34   :  { %v3580_v10 = vmul.f32 %v3572_v48, %v3572_v48 }
0x1a35   :  { %v3583_v51 = vmul.f32 %v3581_v49, %v3577_v46 }
0x1a36   :  { %v3582_v52 = vmul.f32 %v3580_v10, %v3572_v48 }
0x1a37   :  { %v3585_v11 = vmul.f32 0.044715, %v3583_v51 }
0x1a38   :  { %v3584_v53 = vmul.f32 0.044715, %v3582_v52 }
0x1a39   :  { %v3587_v54 = vadd.f32 %v3585_v11, %v3577_v46 }
0x1a3a   :  { %v3586_v57 = vadd.f32 %v3584_v53, %v3572_v48 }
0x1a3b   :  { %v3589_v58 = vmul.f32 0.7978846, %v3587_v54 }
0x1a3c   :  { %v3588_v59 = vmul.f32 0.7978846, %v3586_v57 }
0x1a3d   :  { %4400 = vtanh.f32 %v3589_v58 }
0x1a3e   :  { %4402 = vtanh.f32 %v3588_v59 }
0x1a47   :  { %v4401_v60 = vpop.eup %4400 }
0x1a48   :  { %v4403_v62 = vpop.eup %4402  ;;  %v3593_v0 = vadd.f32 1.0, %v4401_v60 }
0x1a49   :  { %v3592_v6 = vadd.f32 1.0, %v4403_v62 }
0x1a4a   :  { %v3595_v9 = vmul.f32 0.5, %v3593_v0 }
0x1a4b   :  { %v3594_v3 = vmul.f32 0.5, %v3592_v6 }
0x1a4c   :  { %v3597_v12 = vmul.f32 %v3595_v9, %v3577_v46 }
0x1a4d   :  { %v3596_v41 = vmul.f32 %v3594_v3, %v3572_v48 }
0x1a4f   :  { %4215 = vmatprep.mubr.msk.f32.mxu0 %vm1777_vm6, %v3596_v41 }
0x1a50   :  { %4216 = vmatmul.mubr.msk.f32.vlgmr.msra.gmra.mrb[34].mxu0 %vm1777_vm6, %v3597_v12 }
0x1b23   :  { %v4217_v39 = vpop.f32.mrb[34].mxu0 }
0x1b24   :  { %v3680_v8 = vadd.f32 %v4217_v39, %v3601_v13  ;;  %v3674_v14 = vpop.f32.mrb[35].mxu0 }
0x1b25   :  { %v3675_v30 = vadd.f32 %v3674_v14, %v3601_v13 }
0x1b26   :  { %v3684_v15 = vadd.f32 %v3680_v8, %v3492_v42 }
0x1b27   :  { %v3683_v16 = vadd.f32 %v3675_v30, %v3491_v27 }
0x1b28   :  { %v3688_v31 = vsel %vm37_vm0, %v3684_v15, 0.0 }
0x1b29   :  { %3689 = vadd.xlane.f32.xlu1 %v3688_v31  ;;  %v3685_v17 = vsel %vm37_vm0, %v3683_v16, 0.0 }
0x1b2a   :  { %3686 = vadd.xlane.f32.xlu0 %v3685_v17 }
0x1bb6   :  { %v3690_v18 = vpop.xlane.xlu1 %3689 }
0x1bb7   :  { %v3692_v19 = vmul.f32 0.03125, %v3690_v18  ;;  %v3687_v20 = vpop.xlane.xlu0 %3686 }
0x1bb8   :  { %v3691_v21 = vmul.f32 0.03125, %v3687_v20 }
0x1bb9   :  { %v3694_v7 = vsub.f32 %v3684_v15, %v3692_v19 }
0x1bba   :  { %v3693_v33 = vsub.f32 %v3683_v16, %v3691_v21 }
0x1bbb   :  { %v3696_v22 = vmul.f32 %v3694_v7, %v3694_v7 }
0x1bbc   :  { %v3695_v35 = vmul.f32 %v3693_v33, %v3693_v33 }
0x1bbd   :  { %v3700_v5 = vsel %vm37_vm0, %v3696_v22, 0.0 }
0x1bbe   :  { %3701 = vadd.xlane.f32.xlu1 %v3700_v5  ;;  %v3697_v23 = vsel %vm37_vm0, %v3695_v35, 0.0 }
0x1bbf   :  { %3698 = vadd.xlane.f32.xlu0 %v3697_v23 }
0x1c4b   :  { %v3702_v24 = vpop.xlane.xlu1 %3701 }
0x1c4c   :  { %v3704_v61 = vmul.f32 0.03125, %v3702_v24  ;;  %v3699_v25 = vpop.xlane.xlu0 %3698 }
0x1c4d   :  { %v3703_v27 = vmul.f32 0.03125, %v3699_v25 }
0x1c4e   :  { %v3706_v38 = vadd.f32 1e-05, %v3704_v61 }
0x1c4f   :  { %v3705_v42 = vadd.f32 1e-05, %v3703_v27 }
0x1c50   :  { %4404 = vrsqrt.f32 %v3706_v38 }
0x1c51   :  { %4406 = vrsqrt.f32 %v3705_v42 }
0x1c5a   :  { %v4405_v63 = vpop.eup %4404 }
0x1c5b   :  { %v4407_v29 = vpop.eup %4406  ;;  %v3710_v34 = vmul.f32 %v4405_v63, %v3694_v7 }
0x1c5c   :  { %v3709_v28 = vmul.f32 %v4407_v29, %v3693_v33 }
0x1c5d   :  { %v3716_v37 = vmul.f32 %v3714_v32, %v3710_v34 }
0x1c5e   :  { %v3715_v40 = vmul.f32 %v3714_v32, %v3709_v28 }
0x1c5f   :  { %v3722_v43 = vadd.f32 %v3720_v26, %v3716_v37 }
0x1c60   :  { %v3721_v44 = vadd.f32 %v3720_v26, %v3715_v40 }
0x1c61   :  { %3724 = vst.msk [vmem:[#allocation3 + $0x8] sm:$0xff] %vm37_vm0, %v3722_v43 }
0x1c62   :  { %3723 = vst.msk [vmem:[#allocation3] sm:$0xff] %vm37_vm0, %v3721_v44 }
0x1c63   :  { %4419 = shalt.err (!%p4416_p4)
}
0x1c64   :  { %s4420_s0 = scalar_lea.hbm %s5140_s9, 256 }
0x1c65   :  { %p4421_p5 = scmp.ne.s32.totalorder %s5140_s9, %s4420_s0  ;;  %p4424_p6 = scmp.lt.u32.totalorder %s4420_s0, %s5140_s9 }
0x1c67   :  { %p4426_p7 = pnand %p4424_p6, %p4421_p5 }
0x1c69   :  { %4429 = shalt.err (!%p4426_p7)
}
0x1c6a   :  { %s4449_s17 = smov 128  }
0x1c6b   :  { %3736 = dma.vmem_to_hbm [thread:$0]  %s3731_s7, 256, %s5140_s9, [#allocation4], %s4449_s17, %s4449_s17, %s4445_s14  }
0x1c6c   :  { %4430 = dma.done.wait [#allocation4], 256  }
0x1c6d   :  { %4431 = vsyncadd [#allocation4], 4294967040 }
0x1c6e   :  { %3740 = vsyncpa [#allocation4], 1 }

</bundles_post_ra>
